<compile_context>
chip_gen: v5e
topology: v5e:2x2
jax: 0.10.0
libtpu: 0.0.40
codegen_flags: <defaults>
</compile_context>

<pallas_src>
import jax
import jax.numpy as jnp
from jax import lax
from jax.experimental import pallas as pl
from jax.experimental.pallas import tpu as pltpu


def perovnet_shallow_kernel(batch_ref, x_ref, w1_ref, b1_ref,
                            w2_ref, b2_ref, w3_ref, b3_ref, out_ref):
    pid = pl.program_id(0)

    # --- init the resident pooled accumulator (the output block) -------------
    @pl.when(pid == 0)
    def _():
        out_ref[...] = jnp.zeros_like(out_ref)

    x = x_ref[...]                                            # [TILE_N, C_in] bf16

    # --- self.linear + ReLU (bf16 MXU operands, f32 accumulate, K = C_in) ----
    h = jnp.dot(x, w1_ref[...], preferred_element_type=jnp.float32) + b1_ref[...]
    h = jnp.maximum(h, 0.0)                                   # [TILE_N, C_out_p] f32

    # --- self.model: Linear -> ReLU -> Linear --------------------------------
    h = jnp.dot(h.astype(jnp.bfloat16), w2_ref[...],
                preferred_element_type=jnp.float32) + b2_ref[...]
    h = jnp.maximum(h, 0.0)                                   # [TILE_N, HID_p] f32
    h = jnp.dot(h.astype(jnp.bfloat16), w3_ref[...],
                preferred_element_type=jnp.float32) + b3_ref[...]
    # h: [TILE_N, C_out_p] f32

    # --- per-tile scatter_add via exact one-hot matmul (f32 operands) --------
    seg_ids = batch_ref[...]                                  # [1, TILE_N] int32
    n_seg_p = out_ref.shape[0]
    tile_n = x_ref.shape[0]
    seg_iota = lax.broadcasted_iota(jnp.int32, (n_seg_p, tile_n), 0)
    # Padded rows carry segment id == n_seg_p, which never matches -> dropped.
    onehot = (seg_iota == seg_ids).astype(jnp.float32)        # [S_p, TILE_N], exact 0/1
    out_ref[...] += jnp.dot(onehot, h, preferred_element_type=jnp.float32)

    # --- final ReLU, row-wise max, exact normalize (last row-tile only) ------
    @pl.when(pid == pl.num_programs(0) - 1)
    def _():
        pooled = jnp.maximum(out_ref[...], 0.0)
        maxima = jnp.max(pooled, axis=1, keepdims=True)       # torch.max(output, axis=1)
        # Exact divide on a single [S_p, 128] tile; row-max -> exactly 1.0,
        # all-zero rows -> 0/0 = NaN exactly like torch.
        out_ref[...] = pooled / maxima


def _round_up(v, m):
    return ((v + m - 1) // m) * m


def _pad_to(arr, target_shape, pad_value=0):
    pads = [(0, t - s) for s, t in zip(arr.shape, target_shape)]
    if all(p == (0, 0) for p in pads):
        return arr
    return jnp.pad(arr, pads, constant_values=pad_value)


def perovnet_shallow(x, batch, params, num_segments, *, tile_n=1024):
    """x: [N, C_in] f32, batch: [N] int32 segment ids (or None), params: 6 arrays."""
    w1, b1, w2, b2, w3, b3 = params
    n_rows, c_in = x.shape
    hidden = w2.shape[1]
    c_out = w3.shape[1]

    if batch is None:
        # Matches `output.new_ones(N)`: every row scatters to segment 1,
        # segment 0 stays zero (and therefore normalizes to 0/0 = NaN like torch).
        batch = jnp.ones((n_rows,), jnp.int32)
        num_segments = 2

    # Lane/sublane-friendly padded dims (only weights get 128-lane padding;
    # x keeps its native feature width in HBM).
    c_out_p = _round_up(c_out, 128)
    hid_p = _round_up(hidden, 128)
    n_seg_p = _round_up(num_segments, 8)

    # Row tiling: big tiles amortize the ~0.35us/step grid overhead; for small
    # N the whole (row-padded) input goes in one tile -> single grid step.
    # For v7x keep tile_n <= ~4k (f32 intermediates are the binding VMEM term).
    tile_n = max(128, _round_up(tile_n, 128))
    n_pad = _round_up(n_rows, 128)
    if n_pad <= tile_n:
        tile_n = n_pad
    else:
        n_pad = _round_up(n_rows, tile_n)
    grid = (n_pad // tile_n,)

    # x: cast to bf16 BEFORE padding rows (half the pad bytes), no lane padding.
    x_p = _pad_to(x.astype(jnp.bfloat16), (n_pad, c_in))
    # Padded rows scatter nowhere: give them an out-of-range segment id.
    batch_p = _pad_to(batch.astype(jnp.int32), (n_pad,), pad_value=n_seg_p)
    batch2d = batch_p.reshape(1, n_pad)

    # bf16 MXU weight operands; biases stay f32 (accumulate / elementwise is f32).
    w1p = _pad_to(w1, (c_in, c_out_p)).astype(jnp.bfloat16)
    b1p = _pad_to(b1.reshape(1, -1), (1, c_out_p)).astype(jnp.float32)
    w2p = _pad_to(w2, (c_out_p, hid_p)).astype(jnp.bfloat16)
    b2p = _pad_to(b2.reshape(1, -1), (1, hid_p)).astype(jnp.float32)
    w3p = _pad_to(w3, (hid_p, c_out_p)).astype(jnp.bfloat16)
    b3p = _pad_to(b3.reshape(1, -1), (1, c_out_p)).astype(jnp.float32)

    out_p = pl.pallas_call(
        perovnet_shallow_kernel,
        out_shape=jax.ShapeDtypeStruct((n_seg_p, c_out_p), jnp.float32),
        grid_spec=pltpu.PrefetchScalarGridSpec(
            num_scalar_prefetch=0,
            grid=grid,
            in_specs=[
                pl.BlockSpec((1, tile_n), lambda i: (0, i)),          # batch ids
                pl.BlockSpec((tile_n, c_in), lambda i: (i, 0)),       # x row tile (no lane pad)
                pl.BlockSpec((c_in, c_out_p), lambda i: (0, 0)),      # W1 (resident)
                pl.BlockSpec((1, c_out_p), lambda i: (0, 0)),         # b1
                pl.BlockSpec((c_out_p, hid_p), lambda i: (0, 0)),     # W2
                pl.BlockSpec((1, hid_p), lambda i: (0, 0)),           # b2
                pl.BlockSpec((hid_p, c_out_p), lambda i: (0, 0)),     # W3
                pl.BlockSpec((1, c_out_p), lambda i: (0, 0)),         # b3
            ],
            out_specs=pl.BlockSpec((n_seg_p, c_out_p), lambda i: (0, 0)),
        ),
        compiler_params=pltpu.CompilerParams(
            # The row axis is a reduction into one resident output block, so it
            # must stay "arbitrary". (Splitting into per-core partials for
            # v7x's 2 TCs only pays off at much larger N.)
            dimension_semantics=("arbitrary",),
            vmem_limit_bytes=32 * 1024 * 1024,
        ),
    )(batch2d, x_p, w1p, b1p, w2p, b2p, w3p, b3p)

    # Slice back to the real segment count / feature width.
    return out_p[:num_segments, :c_out]


def perovnet_shallow_ref(x, batch, params, num_segments):
    """Pure-JAX f32 reference matching torch semantics."""
    w1, b1, w2, b2, w3, b3 = params
    h = jnp.maximum(x @ w1 + b1, 0.0)
    h = jnp.maximum(h @ w2 + b2, 0.0)
    h = h @ w3 + b3
    pooled = jnp.zeros((num_segments, h.shape[1]), jnp.float32).at[batch].add(h)
    pooled = jnp.maximum(pooled, 0.0)
    return pooled / jnp.max(pooled, axis=1, keepdims=True)


if __name__ == "__main__":
    key = jax.random.PRNGKey(0)
    N, C_IN, C_OUT, HIDDEN, N_SEG = 1000, 16, 32, 64, 6

    ks = jax.random.split(key, 7)
    x = jax.random.normal(ks[0], (N, C_IN), jnp.float32)
    # Weights stored pre-transposed ([in, out]) relative to torch's [out, in];
    # biases kept 2D ([1, out]) for TPU-friendly broadcasting.
    w1 = jax.random.normal(ks[1], (C_IN, C_OUT), jnp.float32) * 0.1
    b1 = jax.random.normal(ks[2], (1, C_OUT), jnp.float32) * 0.1
    w2 = jax.random.normal(ks[3], (C_OUT, HIDDEN), jnp.float32) * 0.1
    b2 = jax.random.normal(ks[4], (1, HIDDEN), jnp.float32) * 0.1
    w3 = jax.random.normal(ks[5], (HIDDEN, C_OUT), jnp.float32) * 0.1
    b3 = jax.random.normal(ks[6], (1, C_OUT), jnp.float32) * 0.1
    params = (w1, b1, w2, b2, w3, b3)

    # Deterministic segment ids: ~N/N_SEG contiguous rows per graph. Many
    # graphs are batched into ONE pallas_call (amortizes launch overhead).
    batch = (jnp.arange(N, dtype=jnp.int32) * N_SEG) // N

    ref = perovnet_shallow_ref(x, batch, params, N_SEG)

    # Default path: single grid step covering all (row-padded) rows.
    out = perovnet_shallow(x, batch, params, N_SEG)
    jax.block_until_ready(out)
    assert out.shape == (N_SEG, C_OUT)
    max_err = float(jnp.max(jnp.abs(out - ref)))
    assert jnp.allclose(out, ref, atol=2e-2, rtol=2e-2), f"mismatch vs reference: {max_err}"

    # Multi-tile path (exercises the accumulate-across-grid-steps logic).
    out_t = perovnet_shallow(x, batch, params, N_SEG, tile_n=256)
    jax.block_until_ready(out_t)
    max_err_t = float(jnp.max(jnp.abs(out_t - ref)))
    assert jnp.allclose(out_t, ref, atol=2e-2, rtol=2e-2), f"tiled mismatch: {max_err_t}"

    # Note: the batch=None default path (all rows -> segment 1) yields a
    # 0/0 = NaN row 0 exactly like the torch code; not exercised in this demo.
    print("KERNEL_OK")
</pallas_src>

<mosaic_0001>
module attributes {stable_mosaic.version = 11 : i64} {
  func.func @perovnet_shallow_kernel(%arg0: i32, %arg1: memref<1x1024xi32, #tpu.memory_space<vmem>>, %arg2: memref<1024x16xbf16, #tpu.memory_space<vmem>>, %arg3: memref<16x128xbf16, #tpu.memory_space<vmem>>, %arg4: memref<1x128xf32, #tpu.memory_space<vmem>>, %arg5: memref<128x128xbf16, #tpu.memory_space<vmem>>, %arg6: memref<1x128xf32, #tpu.memory_space<vmem>>, %arg7: memref<128x128xbf16, #tpu.memory_space<vmem>>, %arg8: memref<1x128xf32, #tpu.memory_space<vmem>>, %arg9: memref<8x128xf32, #tpu.memory_space<vmem>>) attributes {dimension_semantics = [#tpu.dimension_semantics<arbitrary>], iteration_bounds = array<i64: 1>, scalar_prefetch = 0 : i64, scratch_operands = 0 : i64, tpu.core_type = #tpu.core_type<tc>, window_params = [{transform_indices = @transform_0, window_bounds = array<i64: 1, 1024>}, {transform_indices = @transform_1, window_bounds = array<i64: 1024, 16>}, {pipeline_mode = #tpu.pipeline_mode<synchronous>, transform_indices = @transform_2, window_bounds = array<i64: 16, 128>}, {pipeline_mode = #tpu.pipeline_mode<synchronous>, transform_indices = @transform_3, window_bounds = array<i64: 1, 128>}, {pipeline_mode = #tpu.pipeline_mode<synchronous>, transform_indices = @transform_4, window_bounds = array<i64: 128, 128>}, {pipeline_mode = #tpu.pipeline_mode<synchronous>, transform_indices = @transform_5, window_bounds = array<i64: 1, 128>}, {pipeline_mode = #tpu.pipeline_mode<synchronous>, transform_indices = @transform_6, window_bounds = array<i64: 128, 128>}, {pipeline_mode = #tpu.pipeline_mode<synchronous>, transform_indices = @transform_7, window_bounds = array<i64: 1, 128>}, {pipeline_mode = #tpu.pipeline_mode<synchronous>, transform_indices = @transform_8, window_bounds = array<i64: 8, 128>}]} {
    %c0_i32 = arith.constant 0 : i32
    %0 = arith.cmpi eq, %arg0, %c0_i32 : i32
    %1 = arith.extui %0 : i1 to i32
    %c0_i32_0 = arith.constant 0 : i32
    %2 = arith.cmpi ne, %1, %c0_i32_0 : i32
    scf.if %2 {
      %cst_27 = arith.constant 0.000000e+00 : f32
      %38 = vector.broadcast %cst_27 : f32 to vector<8x128xf32>
      %c0_28 = arith.constant 0 : index
      %c0_29 = arith.constant 0 : index
      %39 = vector.load %arg9[%c0_28, %c0_29] : memref<8x128xf32, #tpu.memory_space<vmem>>, vector<8x128xf32>
      tpu.vector_store %arg9[%c0_28, %c0_29], %38 {strides = array<i32>} : memref<8x128xf32, #tpu.memory_space<vmem>>, vector<8x128xf32>,
    } else {
    }
    %c0 = arith.constant 0 : index
    %c0_1 = arith.constant 0 : index
    %3 = vector.load %arg2[%c0, %c0_1] : memref<1024x16xbf16, #tpu.memory_space<vmem>>, vector<1024x16xbf16>
    %c0_2 = arith.constant 0 : index
    %c0_3 = arith.constant 0 : index
    %4 = vector.load %arg3[%c0_2, %c0_3] : memref<16x128xbf16, #tpu.memory_space<vmem>>, vector<16x128xbf16>
    %cst = arith.constant dense<0.000000e+00> : vector<1024x128xf32>
    %5 = tpu.matmul %3, %4, %cst {dimension_numbers = #tpu.dot_dimension_numbers<[1], [0], [0], [1], [0, 0, 1, 1], [], []>} : vector<1024x16xbf16>, vector<16x128xbf16>, vector<1024x128xf32> -> vector<1024x128xf32>
    %c0_4 = arith.constant 0 : index
    %c0_5 = arith.constant 0 : index
    %6 = vector.load %arg4[%c0_4, %c0_5] : memref<1x128xf32, #tpu.memory_space<vmem>>, vector<1x128xf32>
    %7 = vector.broadcast %6 : vector<1x128xf32> to vector<1024x128xf32>
    %8 = arith.addf %5, %7 : vector<1024x128xf32>
    %cst_6 = arith.constant 0.000000e+00 : f32
    %9 = vector.broadcast %cst_6 : f32 to vector<1024x128xf32>
    %10 = arith.maximumf %8, %9 : vector<1024x128xf32>
    %11 = arith.truncf %10 : vector<1024x128xf32> to vector<1024x128xbf16>
    %c0_7 = arith.constant 0 : index
    %c0_8 = arith.constant 0 : index
    %12 = vector.load %arg5[%c0_7, %c0_8] : memref<128x128xbf16, #tpu.memory_space<vmem>>, vector<128x128xbf16>
    %cst_9 = arith.constant dense<0.000000e+00> : vector<1024x128xf32>
    %13 = tpu.matmul %11, %12, %cst_9 {dimension_numbers = #tpu.dot_dimension_numbers<[1], [0], [0], [1], [0, 0, 1, 1], [], []>} : vector<1024x128xbf16>, vector<128x128xbf16>, vector<1024x128xf32> -> vector<1024x128xf32>
    %c0_10 = arith.constant 0 : index
    %c0_11 = arith.constant 0 : index
    %14 = vector.load %arg6[%c0_10, %c0_11] : memref<1x128xf32, #tpu.memory_space<vmem>>, vector<1x128xf32>
    %15 = vector.broadcast %14 : vector<1x128xf32> to vector<1024x128xf32>
    %16 = arith.addf %13, %15 : vector<1024x128xf32>
    %cst_12 = arith.constant 0.000000e+00 : f32
    %17 = vector.broadcast %cst_12 : f32 to vector<1024x128xf32>
    %18 = arith.maximumf %16, %17 : vector<1024x128xf32>
    %19 = arith.truncf %18 : vector<1024x128xf32> to vector<1024x128xbf16>
    %c0_13 = arith.constant 0 : index
    %c0_14 = arith.constant 0 : index
    %20 = vector.load %arg7[%c0_13, %c0_14] : memref<128x128xbf16, #tpu.memory_space<vmem>>, vector<128x128xbf16>
    %cst_15 = arith.constant dense<0.000000e+00> : vector<1024x128xf32>
    %21 = tpu.matmul %19, %20, %cst_15 {dimension_numbers = #tpu.dot_dimension_numbers<[1], [0], [0], [1], [0, 0, 1, 1], [], []>} : vector<1024x128xbf16>, vector<128x128xbf16>, vector<1024x128xf32> -> vector<1024x128xf32>
    %c0_16 = arith.constant 0 : index
    %c0_17 = arith.constant 0 : index
    %22 = vector.load %arg8[%c0_16, %c0_17] : memref<1x128xf32, #tpu.memory_space<vmem>>, vector<1x128xf32>
    %23 = vector.broadcast %22 : vector<1x128xf32> to vector<1024x128xf32>
    %24 = arith.addf %21, %23 : vector<1024x128xf32>
    %c0_18 = arith.constant 0 : index
    %c0_19 = arith.constant 0 : index
    %25 = vector.load %arg1[%c0_18, %c0_19] : memref<1x1024xi32, #tpu.memory_space<vmem>>, vector<1x1024xi32>
    %26 = tpu.iota {dimensions = array<i32: 0>} : vector<8x1024xi32>
    %27 = vector.broadcast %25 : vector<1x1024xi32> to vector<8x1024xi32>
    %28 = arith.cmpi eq, %26, %27 : vector<8x1024xi32>
    %29 = arith.extui %28 : vector<8x1024xi1> to vector<8x1024xi32>
    %30 = arith.sitofp %29 : vector<8x1024xi32> to vector<8x1024xf32>
    %c0_20 = arith.constant 0 : index
    %c0_21 = arith.constant 0 : index
    %31 = vector.load %arg9[%c0_20, %c0_21] : memref<8x128xf32, #tpu.memory_space<vmem>>, vector<8x128xf32>
    %cst_22 = arith.constant dense<0.000000e+00> : vector<8x128xf32>
    %32 = tpu.matmul %30, %24, %cst_22 {dimension_numbers = #tpu.dot_dimension_numbers<[1], [0], [0], [1], [0, 0, 1, 1], [], []>} : vector<8x1024xf32>, vector<1024x128xf32>, vector<8x128xf32> -> vector<8x128xf32>
    %33 = arith.addf %31, %32 : vector<8x128xf32>
    %c0_23 = arith.constant 0 : index
    %c0_24 = arith.constant 0 : index
    %34 = vector.load %arg9[%c0_23, %c0_24] : memref<8x128xf32, #tpu.memory_space<vmem>>, vector<8x128xf32>
    tpu.vector_store %arg9[%c0_23, %c0_24], %33 {strides = array<i32>} : memref<8x128xf32, #tpu.memory_space<vmem>>, vector<8x128xf32>,
    %c0_i32_25 = arith.constant 0 : i32
    %35 = arith.cmpi eq, %arg0, %c0_i32_25 : i32
    %36 = arith.extui %35 : i1 to i32
    %c0_i32_26 = arith.constant 0 : i32
    %37 = arith.cmpi ne, %36, %c0_i32_26 : i32
    scf.if %37 {
      %c0_27 = arith.constant 0 : index
      %c0_28 = arith.constant 0 : index
      %38 = vector.load %arg9[%c0_27, %c0_28] : memref<8x128xf32, #tpu.memory_space<vmem>>, vector<8x128xf32>
      %cst_29 = arith.constant 0.000000e+00 : f32
      %39 = vector.broadcast %cst_29 : f32 to vector<8x128xf32>
      %40 = arith.maximumf %38, %39 : vector<8x128xf32>
      %cst_30 = arith.constant dense<0xFF800000> : vector<8xf32>
      %41 = vector.multi_reduction <maximumf>, %40, %cst_30 [1] : vector<8x128xf32> to vector<8xf32>
      %42 = vector.shape_cast %41 : vector<8xf32> to vector<8x1xf32>
      %43 = vector.broadcast %42 : vector<8x1xf32> to vector<8x128xf32>
      %44 = arith.divf %40, %43 : vector<8x128xf32>
      %c0_31 = arith.constant 0 : index
      %c0_32 = arith.constant 0 : index
      %45 = vector.load %arg9[%c0_31, %c0_32] : memref<8x128xf32, #tpu.memory_space<vmem>>, vector<8x128xf32>
      tpu.vector_store %arg9[%c0_31, %c0_32], %44 {strides = array<i32>} : memref<8x128xf32, #tpu.memory_space<vmem>>, vector<8x128xf32>,
    } else {
    }
    return
  }
  func.func @transform_0(%arg0: i32) -> (i32, i32) {
    %c0_i32 = arith.constant 0 : i32
    %c0_i32_0 = arith.constant 0 : i32
    return %c0_i32, %arg0 : i32, i32
  }
  func.func @transform_1(%arg0: i32) -> (i32, i32) {
    %c0_i32 = arith.constant 0 : i32
    %c0_i32_0 = arith.constant 0 : i32
    return %arg0, %c0_i32 : i32, i32
  }
  func.func @transform_2(%arg0: i32) -> (i32, i32) {
    %c0_i32 = arith.constant 0 : i32
    %c0_i32_0 = arith.constant 0 : i32
    %c0_i32_1 = arith.constant 0 : i32
    return %c0_i32, %c0_i32_0 : i32, i32
  }
  func.func @transform_3(%arg0: i32) -> (i32, i32) {
    %c0_i32 = arith.constant 0 : i32
    %c0_i32_0 = arith.constant 0 : i32
    %c0_i32_1 = arith.constant 0 : i32
    return %c0_i32, %c0_i32_0 : i32, i32
  }
  func.func @transform_4(%arg0: i32) -> (i32, i32) {
    %c0_i32 = arith.constant 0 : i32
    %c0_i32_0 = arith.constant 0 : i32
    %c0_i32_1 = arith.constant 0 : i32
    return %c0_i32, %c0_i32_0 : i32, i32
  }
  func.func @transform_5(%arg0: i32) -> (i32, i32) {
    %c0_i32 = arith.constant 0 : i32
    %c0_i32_0 = arith.constant 0 : i32
    %c0_i32_1 = arith.constant 0 : i32
    return %c0_i32, %c0_i32_0 : i32, i32
  }
  func.func @transform_6(%arg0: i32) -> (i32, i32) {
    %c0_i32 = arith.constant 0 : i32
    %c0_i32_0 = arith.constant 0 : i32
    %c0_i32_1 = arith.constant 0 : i32
    return %c0_i32, %c0_i32_0 : i32, i32
  }
  func.func @transform_7(%arg0: i32) -> (i32, i32) {
    %c0_i32 = arith.constant 0 : i32
    %c0_i32_0 = arith.constant 0 : i32
    %c0_i32_1 = arith.constant 0 : i32
    return %c0_i32, %c0_i32_0 : i32, i32
  }
  func.func @transform_8(%arg0: i32) -> (i32, i32) {
    %c0_i32 = arith.constant 0 : i32
    %c0_i32_0 = arith.constant 0 : i32
    %c0_i32_1 = arith.constant 0 : i32
    return %c0_i32, %c0_i32_0 : i32, i32
  }
}

</mosaic_0001>

<bundles_post_ra>
// kernel: tpu_custom_call.1
= control target key start
LH: loop header
LB: loop body
LE: loop exit
PB: predicated region body
PF: predicated region fallthrough
CT: control target
= control target key end

     0   :  { %vm496_vm0 = vcmask 130048   ;;  %s4214_s0 = inlined_call_operand.vmem [shape: s32[1,1024], index: 0, kind: input, shape index: {}]   ;;  %s4215_s1 = inlined_call_operand.vmem [shape: bf16[1024,16], index: 1, kind: input, shape index: {}]   ;;  %s4216_s2 = inlined_call_operand.vmem [shape: bf16[16,128], index: 2, kind: input, shape index: {}]   ;;  %s4217_s3 = inlined_call_operand.vmem [shape: f32[1,128], index: 3, kind: input, shape index: {}]   ;;  %s4218_s4 = inlined_call_operand.vmem [shape: bf16[128,128], index: 4, kind: input, shape index: {}]   ;;  %s4219_s5 = inlined_call_operand.vmem [shape: f32[1,128], index: 5, kind: input, shape index: {}]   ;;  %s4220_s6 = inlined_call_operand.vmem [shape: bf16[128,128], index: 6, kind: input, shape index: {}]   ;;  %s4221_s7 = inlined_call_operand.vmem [shape: f32[1,128], index: 7, kind: input, shape index: {}]   ;;  %s4222_s8 = inlined_call_operand.hbm [shape: f32[8,128], index: 8, kind: output, shape index: {}]  }
   0x1   :  { %v2901_v0 = vld [vmem:[%s4216_s2] sm:$0xff] }
   0x2   :  { %v2837_v1 = vld [vmem:[%s4215_s1] sm:$0xff]  ;;  %696 = vmatpush.bf16.msra.mxu0 %v2901_v0  ;;  %2918 = vmatpush.bf16.msra.mxu3 %v2901_v0 }
   0x3   :  { %13 = vsyncpa [#allocation3], 0  ;;  %v2838_v2 = vld [vmem:[%s4215_s1 + $0x8] sm:$0xff]  ;;  %v2839_v3 = vld [vmem:[%s4215_s1 + $0x10] sm:$0xff]  ;;  %s2424_s29 = sshll.u32 %s4222_s8, 4  ;;  %s2425_s29 = int_to_ptr.hbm [resolvable:$true] %s2424_s29 }
   0x4   :  { %v2840_v4 = vld [vmem:[%s4215_s1 + $0x18] sm:$0xff]  ;;  %v2841_v5 = vld [vmem:[%s4215_s1 + $0x20] sm:$0xff]  ;;  %v2842_v7 = vld [vmem:[%s4215_s1 + $0x28] sm:$0xff] }
   0x5   :  { %2693 = vmatmul.msk.bf16.vlgmr.msra.gmra.mxu0 %vm496_vm0, %v2837_v1  ;;  %v2909_v6 = vld [vmem:[%s4218_s4 + $0x38] sm:$0xff]  ;;  %v2908_v8 = vld [vmem:[%s4218_s4 + $0x30] sm:$0xff]  ;;  %v2907_v9 = vld [vmem:[%s4218_s4 + $0x28] sm:$0xff] }
   0x6   :  { %1278 = vmatpush.bf16.msra.mxu1 %v2909_v6  ;;  %2919 = vmatpush.bf16.msrb.mxu3 %v2909_v6  ;;  %v2906_v10 = vld [vmem:[%s4218_s4 + $0x20] sm:$0xff]  ;;  %v2905_v11 = vld [vmem:[%s4218_s4 + $0x18] sm:$0xff]  ;;  %v2843_v12 = vld [vmem:[%s4215_s1 + $0x30] sm:$0xff] }
   0x7   :  { %v2904_v13 = vld [vmem:[%s4218_s4 + $0x10] sm:$0xff]  ;;  %v2903_v14 = vld [vmem:[%s4218_s4 + $0x8] sm:$0xff]  ;;  %v2902_v15 = vld [vmem:[%s4218_s4] sm:$0xff] }
   0x8   :  { %v2844_v16 = vld [vmem:[%s4215_s1 + $0x38] sm:$0xff]  ;;  %v2845_v17 = vld [vmem:[%s4215_s1 + $0x40] sm:$0xff]  ;;  %v2846_v26 = vld [vmem:[%s4215_s1 + $0x48] sm:$0xff] }
   0x9   :  { %v3094_v19 = vld [vmem:[%s4217_s3] ss:$0 sm:$0xff]  ;;  %v2847_v34 = vld [vmem:[%s4215_s1 + $0x50] sm:$0xff]  ;;  %v2848_v42 = vld [vmem:[%s4215_s1 + $0x58] sm:$0xff] }
   0xa   :  { %1279 = vmatpush.bf16.msra.mxu1 %v2908_v8  ;;  %2920 = vmatpush.bf16.msrb.mxu3 %v2908_v8  ;;  %v2849_v50 = vld [vmem:[%s4215_s1 + $0x60] sm:$0xff]  ;;  %v2850_v58 = vld [vmem:[%s4215_s1 + $0x68] sm:$0xff]  ;;  %v2917_v63 = vld [vmem:[%s4220_s6 + $0x38] sm:$0xff] }
   0xb   :  { %1867 = vmatpush.bf16.msra.mxu2 %v2917_v63  ;;  %v2915_v6 = vld [vmem:[%s4220_s6 + $0x28] sm:$0xff] }
   0xe   :  { %1280 = vmatpush.bf16.msra.mxu1 %v2907_v9  ;;  %2921 = vmatpush.bf16.msrb.mxu3 %v2907_v9 }
  0x12   :  { %1281 = vmatpush.bf16.msra.mxu1 %v2906_v10  ;;  %2922 = vmatpush.bf16.msrb.mxu3 %v2906_v10 }
  0x15   :  { %2694 = vmatmul.msk.bf16.gmra.mxu0 %vm496_vm0, %v2838_v2 }
  0x16   :  { %1282 = vmatpush.bf16.msra.mxu1 %v2905_v11  ;;  %2923 = vmatpush.bf16.msrb.mxu3 %v2905_v11  ;;  %v2913_v11 = vld [vmem:[%s4220_s6 + $0x18] sm:$0xff] }
  0x1a   :  { %1283 = vmatpush.bf16.msra.mxu1 %v2904_v13  ;;  %2924 = vmatpush.bf16.msrb.mxu3 %v2904_v13 }
  0x1e   :  { %1284 = vmatpush.bf16.msra.mxu1 %v2903_v14  ;;  %2925 = vmatpush.bf16.msrb.mxu3 %v2903_v14 }
  0x22   :  { %1285 = vmatpush.bf16.msra.mxu1 %v2902_v15  ;;  %2926 = vmatpush.bf16.msrb.mxu3 %v2902_v15  ;;  %v2912_v15 = vld [vmem:[%s4220_s6 + $0x10] sm:$0xff] }
  0x25   :  { %2695 = vmatmul.msk.bf16.gmra.mxu0 %vm496_vm0, %v2839_v3  ;;  %v2916_v3 = vld [vmem:[%s4220_s6 + $0x30] sm:$0xff] }
  0x26   :  { %1868 = vmatpush.bf16.msra.mxu2 %v2916_v3  ;;  %v2856_v3 = vld [vmem:[%s4215_s1 + $0x98] sm:$0xff] }
  0x2a   :  { %1869 = vmatpush.bf16.msra.mxu2 %v2915_v6 }
  0x35   :  { %2696 = vmatmul.msk.bf16.gmra.mxu0 %vm496_vm0, %v2840_v4  ;;  %v2851_v4 = vld [vmem:[%s4215_s1 + $0x70] sm:$0xff] }
  0x45   :  { %2697 = vmatmul.msk.bf16.gmra.mxu0 %vm496_vm0, %v2841_v5 }
  0x55   :  { %2698 = vmatmul.msk.bf16.gmra.mxu0 %vm496_vm0, %v2842_v7  ;;  %v2914_v7 = vld [vmem:[%s4220_s6 + $0x20] sm:$0xff] }
  0x56   :  { %1870 = vmatpush.bf16.msra.mxu2 %v2914_v7 }
  0x5a   :  { %1871 = vmatpush.bf16.msra.mxu2 %v2913_v11 }
  0x5e   :  { %1872 = vmatpush.bf16.msra.mxu2 %v2912_v15 }
  0x65   :  { %2699 = vmatmul.msk.bf16.gmra.mxu0 %vm496_vm0, %v2843_v12 }
  0x75   :  { %2700 = vmatmul.msk.bf16.gmra.mxu0 %vm496_vm0, %v2844_v16  ;;  %v2852_v16 = vld [vmem:[%s4215_s1 + $0x78] sm:$0xff] }
  0x82   :  { %v698_v18 = vpop.f32.mrf.mxu0 }
  0x83   :  { %v699_v20 = vadd.f32 %v3094_v19, %v698_v18  ;;  %v2911_v18 = vld [vmem:[%s4220_s6 + $0x8] sm:$0xff] }
  0x84   :  { %1873 = vmatpush.bf16.msra.mxu2 %v2911_v18  ;;  %v2857_v18 = vld [vmem:[%s4215_s1 + $0xa0] sm:$0xff] }
  0x85   :  { %2701 = vmatmul.msk.bf16.gmra.mxu0 %vm496_vm0, %v2845_v17  ;;  %v1018_v23 = vmax.f32 %v699_v20, 0.0  ;;  %v2910_v20 = vld [vmem:[%s4220_s6] sm:$0xff] }
  0x88   :  { %1874 = vmatpush.bf16.msra.mxu2 %v2910_v20 }
  0x8a   :  { %v700_v21 = vpop.f32.mrf.mxu0 }
  0x8b   :  { %v701_v22 = vadd.f32 %v3094_v19, %v700_v21 }
  0x8d   :  { %v1019_v24 = vmax.f32 %v701_v22, 0.0 }
  0x8f   :  { %v1146_v25 = vpack.c.bf16 %v1019_v24, %v1018_v23 }
  0x91   :  { %1286 = vmatmul.bf16.vlgmr.msra.gmra.mxu1 %v1146_v25 }
  0x92   :  { %v703_v27 = vpop.f32.mrf.mxu0 }
  0x93   :  { %v704_v28 = vadd.f32 %v3094_v19, %v703_v27  ;;  %v2853_v27 = vld [vmem:[%s4215_s1 + $0x80] sm:$0xff] }
  0x95   :  { %2702 = vmatmul.msk.bf16.gmra.mxu0 %vm496_vm0, %v2846_v26  ;;  %v1020_v31 = vmax.f32 %v704_v28, 0.0 }
  0x9a   :  { %v705_v29 = vpop.f32.mrf.mxu0 }
  0x9b   :  { %v706_v30 = vadd.f32 %v3094_v19, %v705_v29 }
  0x9d   :  { %v1021_v32 = vmax.f32 %v706_v30, 0.0 }
  0x9f   :  { %v1147_v33 = vpack.c.bf16 %v1021_v32, %v1020_v31 }
  0xa1   :  { %1291 = vmatmul.bf16.gmra.mxu1 %v1147_v33 }
  0xa2   :  { %v708_v35 = vpop.f32.mrf.mxu0 }
  0xa3   :  { %v709_v36 = vadd.f32 %v3094_v19, %v708_v35 }
  0xa5   :  { %2703 = vmatmul.msk.bf16.gmra.mxu0 %vm496_vm0, %v2847_v34  ;;  %v1022_v39 = vmax.f32 %v709_v36, 0.0  ;;  %v3174_v36 = vld [vmem:[%s4219_s5] ss:$0 sm:$0xff] }
  0xaa   :  { %v710_v37 = vpop.f32.mrf.mxu0 }
  0xab   :  { %v711_v38 = vadd.f32 %v3094_v19, %v710_v37  ;;  %v2854_v37 = vld [vmem:[%s4215_s1 + $0x88] sm:$0xff] }
  0xad   :  { %v1023_v40 = vmax.f32 %v711_v38, 0.0 }
  0xaf   :  { %v1148_v41 = vpack.c.bf16 %v1023_v40, %v1022_v39 }
  0xb1   :  { %1296 = vmatmul.bf16.gmra.mxu1 %v1148_v41 }
  0xb2   :  { %v713_v43 = vpop.f32.mrf.mxu0 }
  0xb3   :  { %v714_v44 = vadd.f32 %v3094_v19, %v713_v43 }
  0xb5   :  { %2704 = vmatmul.msk.bf16.gmra.mxu0 %vm496_vm0, %v2848_v42  ;;  %v1024_v47 = vmax.f32 %v714_v44, 0.0 }
  0xba   :  { %v715_v45 = vpop.f32.mrf.mxu0 }
  0xbb   :  { %v716_v46 = vadd.f32 %v3094_v19, %v715_v45 }
  0xbd   :  { %v1025_v48 = vmax.f32 %v716_v46, 0.0 }
  0xbf   :  { %v1149_v49 = vpack.c.bf16 %v1025_v48, %v1024_v47 }
  0xc1   :  { %1301 = vmatmul.bf16.gmra.mxu1 %v1149_v49 }
  0xc2   :  { %v718_v51 = vpop.f32.mrf.mxu0 }
  0xc3   :  { %v719_v52 = vadd.f32 %v3094_v19, %v718_v51 }
  0xc5   :  { %2705 = vmatmul.msk.bf16.gmra.mxu0 %vm496_vm0, %v2849_v50  ;;  %v1026_v55 = vmax.f32 %v719_v52, 0.0  ;;  %v2855_v52 = vld [vmem:[%s4215_s1 + $0x90] sm:$0xff] }
  0xca   :  { %v720_v53 = vpop.f32.mrf.mxu0 }
  0xcb   :  { %v721_v54 = vadd.f32 %v3094_v19, %v720_v53 }
  0xcd   :  { %v1027_v56 = vmax.f32 %v721_v54, 0.0 }
  0xcf   :  { %v1150_v57 = vpack.c.bf16 %v1027_v56, %v1026_v55 }
  0xd1   :  { %1306 = vmatmul.bf16.gmra.mxu1 %v1150_v57 }
  0xd2   :  { %v723_v59 = vpop.f32.mrf.mxu0 }
  0xd3   :  { %v724_v60 = vadd.f32 %v3094_v19, %v723_v59 }
  0xd5   :  { %2706 = vmatmul.msk.bf16.gmra.mxu0 %vm496_vm0, %v2850_v58  ;;  %v1028_v0 = vmax.f32 %v724_v60, 0.0 }
  0xda   :  { %v725_v61 = vpop.f32.mrf.mxu0 }
  0xdb   :  { %v726_v62 = vadd.f32 %v3094_v19, %v725_v61 }
  0xdd   :  { %v1029_v1 = vmax.f32 %v726_v62, 0.0 }
  0xdf   :  { %v1151_v2 = vpack.c.bf16 %v1029_v1, %v1028_v0 }
  0xe1   :  { %1311 = vmatmul.bf16.gmra.mxu1 %v1151_v2 }
  0xe2   :  { %v728_v5 = vpop.f32.mrf.mxu0 }
  0xe3   :  { %v729_v8 = vadd.f32 %v3094_v19, %v728_v5 }
  0xe5   :  { %2707 = vmatmul.msk.bf16.gmra.mxu0 %vm496_vm0, %v2851_v4  ;;  %v1030_v12 = vmax.f32 %v729_v8, 0.0 }
  0xea   :  { %v730_v9 = vpop.f32.mrf.mxu0 }
  0xeb   :  { %v731_v10 = vadd.f32 %v3094_v19, %v730_v9 }
  0xed   :  { %v1031_v13 = vmax.f32 %v731_v10, 0.0 }
  0xef   :  { %v1152_v14 = vpack.c.bf16 %v1031_v13, %v1030_v12 }
  0xf1   :  { %1316 = vmatmul.bf16.gmra.mxu1 %v1152_v14 }
  0xf2   :  { %v733_v17 = vpop.f32.mrf.mxu0 }
  0xf3   :  { %v734_v21 = vadd.f32 %v3094_v19, %v733_v17 }
  0xf5   :  { %2708 = vmatmul.msk.bf16.gmra.mxu0 %vm496_vm0, %v2852_v16  ;;  %v1032_v24 = vmax.f32 %v734_v21, 0.0 }
  0xfa   :  { %v735_v22 = vpop.f32.mrf.mxu0 }
  0xfb   :  { %v736_v23 = vadd.f32 %v3094_v19, %v735_v22 }
  0xfd   :  { %v1033_v25 = vmax.f32 %v736_v23, 0.0 }
  0xff   :  { %v1153_v26 = vpack.c.bf16 %v1033_v25, %v1032_v24 }
 0x101   :  { %1321 = vmatmul.bf16.gmra.mxu1 %v1153_v26 }
 0x102   :  { %v738_v28 = vpop.f32.mrf.mxu0 }
 0x103   :  { %v739_v29 = vadd.f32 %v3094_v19, %v738_v28 }
 0x105   :  { %2709 = vmatmul.msk.bf16.gmra.mxu0 %vm496_vm0, %v2853_v27  ;;  %v1034_v32 = vmax.f32 %v739_v29, 0.0 }
 0x10a   :  { %v740_v30 = vpop.f32.mrf.mxu0 }
 0x10b   :  { %v741_v31 = vadd.f32 %v3094_v19, %v740_v30 }
 0x10d   :  { %v1035_v33 = vmax.f32 %v741_v31, 0.0 }
 0x10e   :  { %v1287_v34 = vpop.f32.mrf.mxu1 }
 0x10f   :  { %v1154_v35 = vpack.c.bf16 %v1035_v33, %v1034_v32  ;;  %v1288_v39 = vadd.f32 %v3174_v36, %v1287_v34  ;;  %v2858_v34 = vld [vmem:[%s4215_s1 + $0xa8] sm:$0xff] }
 0x111   :  { %1326 = vmatmul.bf16.gmra.mxu1 %v1154_v35  ;;  %v1607_v42 = vmax.f32 %v1288_v39, 0.0 }
 0x112   :  { %v743_v38 = vpop.f32.mrf.mxu0 }
 0x113   :  { %v744_v43 = vadd.f32 %v3094_v19, %v743_v38 }
 0x115   :  { %2710 = vmatmul.msk.bf16.gmra.mxu0 %vm496_vm0, %v2854_v37  ;;  %v1036_v48 = vmax.f32 %v744_v43, 0.0 }
 0x116   :  { %v1289_v40 = vpop.f32.mrf.mxu1 }
 0x117   :  { %v1290_v41 = vadd.f32 %v3174_v36, %v1289_v40 }
 0x119   :  { %v1608_v44 = vmax.f32 %v1290_v41, 0.0 }
 0x11a   :  { %v745_v45 = vpop.f32.mrf.mxu0 }
 0x11b   :  { %v746_v46 = vadd.f32 %v3094_v19, %v745_v45  ;;  %v1735_v47 = vpack.c.bf16 %v1608_v44, %v1607_v42 }
 0x11d   :  { %v1037_v49 = vmax.f32 %v746_v46, 0.0  ;;  %1875 = vmatmul.bf16.vlgmr.msra.gmra.mxu2 %v1735_v47 }
 0x11e   :  { %v1292_v50 = vpop.f32.mrf.mxu1 }
 0x11f   :  { %v1155_v51 = vpack.c.bf16 %v1037_v49, %v1036_v48  ;;  %v1293_v54 = vadd.f32 %v3174_v36, %v1292_v50  ;;  %v2859_v50 = vld [vmem:[%s4215_s1 + $0xb0] sm:$0xff] }
 0x121   :  { %1331 = vmatmul.bf16.gmra.mxu1 %v1155_v51  ;;  %v1609_v57 = vmax.f32 %v1293_v54, 0.0 }
 0x122   :  { %v748_v53 = vpop.f32.mrf.mxu0 }
 0x123   :  { %v749_v58 = vadd.f32 %v3094_v19, %v748_v53 }
 0x125   :  { %2711 = vmatmul.msk.bf16.gmra.mxu0 %vm496_vm0, %v2855_v52  ;;  %v1038_v63 = vmax.f32 %v749_v58, 0.0 }
 0x126   :  { %v1294_v55 = vpop.f32.mrf.mxu1 }
 0x127   :  { %v1295_v56 = vadd.f32 %v3174_v36, %v1294_v55 }
 0x129   :  { %v1610_v59 = vmax.f32 %v1295_v56, 0.0 }
 0x12a   :  { %v750_v60 = vpop.f32.mrf.mxu0 }
 0x12b   :  { %v751_v61 = vadd.f32 %v3094_v19, %v750_v60  ;;  %v1736_v62 = vpack.c.bf16 %v1610_v59, %v1609_v57 }
 0x12d   :  { %v1039_v0 = vmax.f32 %v751_v61, 0.0  ;;  %1880 = vmatmul.bf16.gmra.mxu2 %v1736_v62 }
 0x12e   :  { %v1297_v1 = vpop.f32.mrf.mxu1 }
 0x12f   :  { %v1156_v2 = vpack.c.bf16 %v1039_v0, %v1038_v63  ;;  %v1298_v5 = vadd.f32 %v3174_v36, %v1297_v1  ;;  %v2860_v1 = vld [vmem:[%s4215_s1 + $0xb8] sm:$0xff] }
 0x131   :  { %1336 = vmatmul.bf16.gmra.mxu1 %v1156_v2  ;;  %v1611_v8 = vmax.f32 %v1298_v5, 0.0 }
 0x132   :  { %v753_v4 = vpop.f32.mrf.mxu0 }
 0x133   :  { %v754_v9 = vadd.f32 %v3094_v19, %v753_v4 }
 0x135   :  { %2712 = vmatmul.msk.bf16.gmra.mxu0 %vm496_vm0, %v2856_v3  ;;  %v1040_v14 = vmax.f32 %v754_v9, 0.0 }
 0x136   :  { %v1299_v6 = vpop.f32.mrf.mxu1 }
 0x137   :  { %v1300_v7 = vadd.f32 %v3174_v36, %v1299_v6 }
 0x139   :  { %v1612_v10 = vmax.f32 %v1300_v7, 0.0 }
 0x13a   :  { %v755_v11 = vpop.f32.mrf.mxu0 }
 0x13b   :  { %v756_v12 = vadd.f32 %v3094_v19, %v755_v11  ;;  %v1737_v13 = vpack.c.bf16 %v1612_v10, %v1611_v8 }
 0x13d   :  { %v1041_v15 = vmax.f32 %v756_v12, 0.0  ;;  %1885 = vmatmul.bf16.gmra.mxu2 %v1737_v13 }
 0x13e   :  { %v1302_v16 = vpop.f32.mrf.mxu1 }
 0x13f   :  { %v1157_v17 = vpack.c.bf16 %v1041_v15, %v1040_v14  ;;  %v1303_v21 = vadd.f32 %v3174_v36, %v1302_v16  ;;  %v2861_v16 = vld [vmem:[%s4215_s1 + $0xc0] sm:$0xff] }
 0x141   :  { %1341 = vmatmul.bf16.gmra.mxu1 %v1157_v17  ;;  %v1613_v24 = vmax.f32 %v1303_v21, 0.0 }
 0x142   :  { %v758_v20 = vpop.f32.mrf.mxu0 }
 0x143   :  { %v759_v25 = vadd.f32 %v3094_v19, %v758_v20 }
 0x145   :  { %2713 = vmatmul.msk.bf16.gmra.mxu0 %vm496_vm0, %v2857_v18  ;;  %v1042_v30 = vmax.f32 %v759_v25, 0.0 }
 0x146   :  { %v1304_v22 = vpop.f32.mrf.mxu1 }
 0x147   :  { %v1305_v23 = vadd.f32 %v3174_v36, %v1304_v22 }
 0x149   :  { %v1614_v26 = vmax.f32 %v1305_v23, 0.0 }
 0x14a   :  { %v760_v27 = vpop.f32.mrf.mxu0 }
 0x14b   :  { %v761_v28 = vadd.f32 %v3094_v19, %v760_v27  ;;  %v1738_v29 = vpack.c.bf16 %v1614_v26, %v1613_v24 }
 0x14d   :  { %v1043_v31 = vmax.f32 %v761_v28, 0.0  ;;  %1890 = vmatmul.bf16.gmra.mxu2 %v1738_v29 }
 0x14e   :  { %v1307_v32 = vpop.f32.mrf.mxu1 }
 0x14f   :  { %v1158_v33 = vpack.c.bf16 %v1043_v31, %v1042_v30  ;;  %v1308_v37 = vadd.f32 %v3174_v36, %v1307_v32  ;;  %v2862_v32 = vld [vmem:[%s4215_s1 + $0xc8] sm:$0xff] }
 0x151   :  { %1346 = vmatmul.bf16.gmra.mxu1 %v1158_v33  ;;  %v1615_v40 = vmax.f32 %v1308_v37, 0.0 }
 0x152   :  { %v763_v35 = vpop.f32.mrf.mxu0 }
 0x153   :  { %v764_v41 = vadd.f32 %v3094_v19, %v763_v35 }
 0x155   :  { %2714 = vmatmul.msk.bf16.gmra.mxu0 %vm496_vm0, %v2858_v34  ;;  %v1044_v46 = vmax.f32 %v764_v41, 0.0 }
 0x156   :  { %v1309_v38 = vpop.f32.mrf.mxu1 }
 0x157   :  { %v1310_v39 = vadd.f32 %v3174_v36, %v1309_v38 }
 0x159   :  { %v1616_v42 = vmax.f32 %v1310_v39, 0.0 }
 0x15a   :  { %v765_v43 = vpop.f32.mrf.mxu0 }
 0x15b   :  { %v766_v44 = vadd.f32 %v3094_v19, %v765_v43  ;;  %v1739_v45 = vpack.c.bf16 %v1616_v42, %v1615_v40 }
 0x15d   :  { %v1045_v47 = vmax.f32 %v766_v44, 0.0  ;;  %1895 = vmatmul.bf16.gmra.mxu2 %v1739_v45 }
 0x15e   :  { %v1312_v48 = vpop.f32.mrf.mxu1 }
 0x15f   :  { %v1159_v49 = vpack.c.bf16 %v1045_v47, %v1044_v46  ;;  %v1313_v52 = vadd.f32 %v3174_v36, %v1312_v48 }
 0x161   :  { %1351 = vmatmul.bf16.gmra.mxu1 %v1159_v49  ;;  %v1617_v55 = vmax.f32 %v1313_v52, 0.0  ;;  %v2863_v49 = vld [vmem:[%s4215_s1 + $0xd0] sm:$0xff] }
 0x162   :  { %v768_v51 = vpop.f32.mrf.mxu0 }
 0x163   :  { %v769_v56 = vadd.f32 %v3094_v19, %v768_v51 }
 0x165   :  { %2715 = vmatmul.msk.bf16.gmra.mxu0 %vm496_vm0, %v2859_v50  ;;  %v1046_v61 = vmax.f32 %v769_v56, 0.0 }
 0x166   :  { %v1314_v53 = vpop.f32.mrf.mxu1 }
 0x167   :  { %v1315_v54 = vadd.f32 %v3174_v36, %v1314_v53 }
 0x169   :  { %v1618_v57 = vmax.f32 %v1315_v54, 0.0 }
 0x16a   :  { %v770_v58 = vpop.f32.mrf.mxu0 }
 0x16b   :  { %v771_v59 = vadd.f32 %v3094_v19, %v770_v58  ;;  %v1740_v60 = vpack.c.bf16 %v1618_v57, %v1617_v55 }
 0x16d   :  { %v1047_v62 = vmax.f32 %v771_v59, 0.0  ;;  %1900 = vmatmul.bf16.gmra.mxu2 %v1740_v60 }
 0x16e   :  { %v1317_v63 = vpop.f32.mrf.mxu1 }
 0x16f   :  { %v1160_v0 = vpack.c.bf16 %v1047_v62, %v1046_v61  ;;  %v1318_v3 = vadd.f32 %v3174_v36, %v1317_v63 }
 0x171   :  { %1356 = vmatmul.bf16.gmra.mxu1 %v1160_v0  ;;  %v1619_v6 = vmax.f32 %v1318_v3, 0.0 }
 0x172   :  { %v773_v2 = vpop.f32.mrf.mxu0 }
 0x173   :  { %v774_v7 = vadd.f32 %v3094_v19, %v773_v2  ;;  %v2864_v2 = vld [vmem:[%s4215_s1 + $0xd8] sm:$0xff] }
 0x175   :  { %2716 = vmatmul.msk.bf16.gmra.mxu0 %vm496_vm0, %v2860_v1  ;;  %v1048_v12 = vmax.f32 %v774_v7, 0.0 }
 0x176   :  { %v1319_v4 = vpop.f32.mrf.mxu1 }
 0x177   :  { %v1320_v5 = vadd.f32 %v3174_v36, %v1319_v4 }
 0x179   :  { %v1620_v8 = vmax.f32 %v1320_v5, 0.0 }
 0x17a   :  { %v775_v9 = vpop.f32.mrf.mxu0 }
 0x17b   :  { %v776_v10 = vadd.f32 %v3094_v19, %v775_v9  ;;  %v1741_v11 = vpack.c.bf16 %v1620_v8, %v1619_v6 }
 0x17d   :  { %v1049_v13 = vmax.f32 %v776_v10, 0.0  ;;  %1905 = vmatmul.bf16.gmra.mxu2 %v1741_v11 }
 0x17e   :  { %v1322_v14 = vpop.f32.mrf.mxu1 }
 0x17f   :  { %v1161_v15 = vpack.c.bf16 %v1049_v13, %v1048_v12  ;;  %v1323_v18 = vadd.f32 %v3174_v36, %v1322_v14 }
 0x181   :  { %1361 = vmatmul.bf16.gmra.mxu1 %v1161_v15  ;;  %v1621_v22 = vmax.f32 %v1323_v18, 0.0 }
 0x182   :  { %v778_v17 = vpop.f32.mrf.mxu0 }
 0x183   :  { %v779_v23 = vadd.f32 %v3094_v19, %v778_v17 }
 0x185   :  { %2717 = vmatmul.msk.bf16.gmra.mxu0 %vm496_vm0, %v2861_v16  ;;  %v1050_v28 = vmax.f32 %v779_v23, 0.0 }
 0x186   :  { %v1324_v20 = vpop.f32.mrf.mxu1 }
 0x187   :  { %v1325_v21 = vadd.f32 %v3174_v36, %v1324_v20  ;;  %v2865_v20 = vld [vmem:[%s4215_s1 + $0xe0] sm:$0xff] }
 0x189   :  { %v1622_v24 = vmax.f32 %v1325_v21, 0.0 }
 0x18a   :  { %v780_v25 = vpop.f32.mrf.mxu0 }
 0x18b   :  { %v781_v26 = vadd.f32 %v3094_v19, %v780_v25  ;;  %v1742_v27 = vpack.c.bf16 %v1622_v24, %v1621_v22 }
 0x18d   :  { %v1051_v29 = vmax.f32 %v781_v26, 0.0  ;;  %1910 = vmatmul.bf16.gmra.mxu2 %v1742_v27 }
 0x18e   :  { %v1327_v30 = vpop.f32.mrf.mxu1 }
 0x18f   :  { %v1162_v31 = vpack.c.bf16 %v1051_v29, %v1050_v28  ;;  %v1328_v34 = vadd.f32 %v3174_v36, %v1327_v30 }
 0x191   :  { %1366 = vmatmul.bf16.gmra.mxu1 %v1162_v31  ;;  %v1623_v38 = vmax.f32 %v1328_v34, 0.0 }
 0x192   :  { %v783_v33 = vpop.f32.mrf.mxu0 }
 0x193   :  { %v784_v39 = vadd.f32 %v3094_v19, %v783_v33 }
 0x195   :  { %2718 = vmatmul.msk.bf16.gmra.mxu0 %vm496_vm0, %v2862_v32  ;;  %v1052_v44 = vmax.f32 %v784_v39, 0.0 }
 0x196   :  { %v1329_v35 = vpop.f32.mrf.mxu1 }
 0x197   :  { %v1330_v37 = vadd.f32 %v3174_v36, %v1329_v35 }
 0x199   :  { %v1624_v40 = vmax.f32 %v1330_v37, 0.0 }
 0x19a   :  { %v785_v41 = vpop.f32.mrf.mxu0 }
 0x19b   :  { %v786_v42 = vadd.f32 %v3094_v19, %v785_v41  ;;  %v1743_v43 = vpack.c.bf16 %v1624_v40, %v1623_v38  ;;  %v2866_v38 = vld [vmem:[%s4215_s1 + $0xe8] sm:$0xff] }
 0x19d   :  { %v1053_v45 = vmax.f32 %v786_v42, 0.0  ;;  %1915 = vmatmul.bf16.gmra.mxu2 %v1743_v43 }
 0x19e   :  { %v1332_v46 = vpop.f32.mrf.mxu1 }
 0x19f   :  { %v1163_v47 = vpack.c.bf16 %v1053_v45, %v1052_v44  ;;  %v1333_v51 = vadd.f32 %v3174_v36, %v1332_v46 }
 0x1a0   :  { %v3248_v48 = vpop.f32.mrf.mxu2 }
 0x1a1   :  { %1371 = vmatmul.bf16.gmra.mxu1 %v1163_v47  ;;  %v1625_v55 = vmax.f32 %v1333_v51, 0.0 }
 0x1a2   :  { %v788_v50 = vpop.f32.mrf.mxu0 }
 0x1a3   :  { %v789_v56 = vadd.f32 %v3094_v19, %v788_v50 }
 0x1a5   :  { %2719 = vmatmul.msk.bf16.gmra.mxu0 %vm496_vm0, %v2863_v49  ;;  %v1054_v61 = vmax.f32 %v789_v56, 0.0 }
 0x1a6   :  { %v1334_v52 = vpop.f32.mrf.mxu1 }
 0x1a7   :  { %v1335_v53 = vadd.f32 %v3174_v36, %v1334_v52 }
 0x1a8   :  { %v3256_v54 = vpop.f32.mrf.mxu2 }
 0x1a9   :  { %v1626_v57 = vmax.f32 %v1335_v53, 0.0 }
 0x1aa   :  { %v790_v58 = vpop.f32.mrf.mxu0 }
 0x1ab   :  { %v791_v59 = vadd.f32 %v3094_v19, %v790_v58  ;;  %v1744_v60 = vpack.c.bf16 %v1626_v57, %v1625_v55  ;;  %v2867_v57 = vld [vmem:[%s4215_s1 + $0xf0] sm:$0xff] }
 0x1ad   :  { %v1055_v62 = vmax.f32 %v791_v59, 0.0  ;;  %1920 = vmatmul.bf16.gmra.mxu2 %v1744_v60 }
 0x1ae   :  { %v1337_v63 = vpop.f32.mrf.mxu1 }
 0x1af   :  { %v1164_v0 = vpack.c.bf16 %v1055_v62, %v1054_v61  ;;  %v1338_v4 = vadd.f32 %v3174_v36, %v1337_v63 }
 0x1b0   :  { %v3260_v1 = vpop.f32.mrf.mxu2 }
 0x1b1   :  { %1376 = vmatmul.bf16.gmra.mxu1 %v1164_v0  ;;  %v1627_v8 = vmax.f32 %v1338_v4, 0.0 }
 0x1b2   :  { %v793_v3 = vpop.f32.mrf.mxu0 }
 0x1b3   :  { %v794_v9 = vadd.f32 %v3094_v19, %v793_v3 }
 0x1b5   :  { %2720 = vmatmul.msk.bf16.gmra.mxu0 %vm496_vm0, %v2864_v2  ;;  %v1056_v14 = vmax.f32 %v794_v9, 0.0 }
 0x1b6   :  { %v1339_v5 = vpop.f32.mrf.mxu1 }
 0x1b7   :  { %v1340_v6 = vadd.f32 %v3174_v36, %v1339_v5 }
 0x1b8   :  { %v3268_v7 = vpop.f32.mrf.mxu2 }
 0x1b9   :  { %v1628_v10 = vmax.f32 %v1340_v6, 0.0 }
 0x1ba   :  { %v795_v11 = vpop.f32.mrf.mxu0 }
 0x1bb   :  { %v796_v12 = vadd.f32 %v3094_v19, %v795_v11  ;;  %v1745_v13 = vpack.c.bf16 %v1628_v10, %v1627_v8 }
 0x1bd   :  { %v1057_v15 = vmax.f32 %v796_v12, 0.0  ;;  %1925 = vmatmul.bf16.gmra.mxu2 %v1745_v13  ;;  %v2868_v12 = vld [vmem:[%s4215_s1 + $0xf8] sm:$0xff] }
 0x1be   :  { %v1342_v16 = vpop.f32.mrf.mxu1 }
 0x1bf   :  { %v1165_v17 = vpack.c.bf16 %v1057_v15, %v1056_v14  ;;  %v1343_v22 = vadd.f32 %v3174_v36, %v1342_v16 }
 0x1c0   :  { %v3272_v18 = vpop.f32.mrf.mxu2 }
 0x1c1   :  { %1381 = vmatmul.bf16.gmra.mxu1 %v1165_v17  ;;  %v1629_v26 = vmax.f32 %v1343_v22, 0.0 }
 0x1c2   :  { %v798_v21 = vpop.f32.mrf.mxu0 }
 0x1c3   :  { %v799_v27 = vadd.f32 %v3094_v19, %v798_v21 }
 0x1c5   :  { %2721 = vmatmul.msk.bf16.gmra.mxu0 %vm496_vm0, %v2865_v20  ;;  %v1058_v32 = vmax.f32 %v799_v27, 0.0 }
 0x1c6   :  { %v1344_v23 = vpop.f32.mrf.mxu1 }
 0x1c7   :  { %v1345_v24 = vadd.f32 %v3174_v36, %v1344_v23 }
 0x1c8   :  { %v3280_v25 = vpop.f32.mrf.mxu2 }
 0x1c9   :  { %v1630_v28 = vmax.f32 %v1345_v24, 0.0 }
 0x1ca   :  { %v800_v29 = vpop.f32.mrf.mxu0 }
 0x1cb   :  { %v801_v30 = vadd.f32 %v3094_v19, %v800_v29  ;;  %v1746_v31 = vpack.c.bf16 %v1630_v28, %v1629_v26 }
 0x1cd   :  { %v1059_v33 = vmax.f32 %v801_v30, 0.0  ;;  %1930 = vmatmul.bf16.gmra.mxu2 %v1746_v31 }
 0x1ce   :  { %v1347_v34 = vpop.f32.mrf.mxu1 }
 0x1cf   :  { %v1166_v35 = vpack.c.bf16 %v1059_v33, %v1058_v32  ;;  %v1348_v40 = vadd.f32 %v3174_v36, %v1347_v34  ;;  %v2869_v32 = vld [vmem:[%s4215_s1 + $0x100] sm:$0xff] }
 0x1d0   :  { %v3284_v37 = vpop.f32.mrf.mxu2 }
 0x1d1   :  { %1386 = vmatmul.bf16.gmra.mxu1 %v1166_v35  ;;  %v1631_v44 = vmax.f32 %v1348_v40, 0.0 }
 0x1d2   :  { %v803_v39 = vpop.f32.mrf.mxu0 }
 0x1d3   :  { %v804_v45 = vadd.f32 %v3094_v19, %v803_v39 }
 0x1d5   :  { %2722 = vmatmul.msk.bf16.gmra.mxu0 %vm496_vm0, %v2866_v38  ;;  %v1060_v51 = vmax.f32 %v804_v45, 0.0 }
 0x1d6   :  { %v1349_v41 = vpop.f32.mrf.mxu1 }
 0x1d7   :  { %v1350_v42 = vadd.f32 %v3174_v36, %v1349_v41 }
 0x1d8   :  { %v3292_v43 = vpop.f32.mrf.mxu2 }
 0x1d9   :  { %v1632_v46 = vmax.f32 %v1350_v42, 0.0 }
 0x1da   :  { %v805_v47 = vpop.f32.mrf.mxu0 }
 0x1db   :  { %v806_v49 = vadd.f32 %v3094_v19, %v805_v47  ;;  %v1747_v50 = vpack.c.bf16 %v1632_v46, %v1631_v44 }
 0x1dd   :  { %v1061_v52 = vmax.f32 %v806_v49, 0.0  ;;  %1935 = vmatmul.bf16.gmra.mxu2 %v1747_v50 }
 0x1de   :  { %v1352_v53 = vpop.f32.mrf.mxu1 }
 0x1df   :  { %v1167_v55 = vpack.c.bf16 %v1061_v52, %v1060_v51  ;;  %v1353_v59 = vadd.f32 %v3174_v36, %v1352_v53  ;;  %v2870_v53 = vld [vmem:[%s4215_s1 + $0x108] sm:$0xff] }
 0x1e0   :  { %v3296_v56 = vpop.f32.mrf.mxu2 }
 0x1e1   :  { %1391 = vmatmul.bf16.gmra.mxu1 %v1167_v55  ;;  %v1633_v63 = vmax.f32 %v1353_v59, 0.0 }
 0x1e2   :  { %v808_v58 = vpop.f32.mrf.mxu0 }
 0x1e3   :  { %v809_v0 = vadd.f32 %v3094_v19, %v808_v58 }
 0x1e5   :  { %2723 = vmatmul.msk.bf16.gmra.mxu0 %vm496_vm0, %v2867_v57  ;;  %v1062_v6 = vmax.f32 %v809_v0, 0.0 }
 0x1e6   :  { %v1354_v60 = vpop.f32.mrf.mxu1 }
 0x1e7   :  { %v1355_v61 = vadd.f32 %v3174_v36, %v1354_v60 }
 0x1e8   :  { %v3304_v62 = vpop.f32.mrf.mxu2 }
 0x1e9   :  { %v1634_v2 = vmax.f32 %v1355_v61, 0.0 }
 0x1ea   :  { %v810_v3 = vpop.f32.mrf.mxu0 }
 0x1eb   :  { %v811_v4 = vadd.f32 %v3094_v19, %v810_v3  ;;  %v1748_v5 = vpack.c.bf16 %v1634_v2, %v1633_v63 }
 0x1ed   :  { %v1063_v8 = vmax.f32 %v811_v4, 0.0  ;;  %1940 = vmatmul.bf16.gmra.mxu2 %v1748_v5 }
 0x1ee   :  { %v1357_v9 = vpop.f32.mrf.mxu1 }
 0x1ef   :  { %v1168_v10 = vpack.c.bf16 %v1063_v8, %v1062_v6  ;;  %v1358_v14 = vadd.f32 %v3174_v36, %v1357_v9 }
 0x1f0   :  { %v3308_v11 = vpop.f32.mrf.mxu2 }
 0x1f1   :  { %1396 = vmatmul.bf16.gmra.mxu1 %v1168_v10  ;;  %v1635_v20 = vmax.f32 %v1358_v14, 0.0 }
 0x1f2   :  { %v813_v13 = vpop.f32.mrf.mxu0 }
 0x1f3   :  { %v814_v21 = vadd.f32 %v3094_v19, %v813_v13 }
 0x1f5   :  { %2724 = vmatmul.msk.bf16.gmra.mxu0 %vm496_vm0, %v2868_v12  ;;  %v1064_v27 = vmax.f32 %v814_v21, 0.0  ;;  %v2871_v12 = vld [vmem:[%s4215_s1 + $0x110] sm:$0xff] }
 0x1f6   :  { %v1359_v15 = vpop.f32.mrf.mxu1 }
 0x1f7   :  { %v1360_v16 = vadd.f32 %v3174_v36, %v1359_v15 }
 0x1f8   :  { %v3316_v17 = vpop.f32.mrf.mxu2 }
 0x1f9   :  { %v1636_v22 = vmax.f32 %v1360_v16, 0.0 }
 0x1fa   :  { %v815_v23 = vpop.f32.mrf.mxu0 }
 0x1fb   :  { %v816_v24 = vadd.f32 %v3094_v19, %v815_v23  ;;  %v1749_v26 = vpack.c.bf16 %v1636_v22, %v1635_v20 }
 0x1fd   :  { %v1065_v28 = vmax.f32 %v816_v24, 0.0  ;;  %1945 = vmatmul.bf16.gmra.mxu2 %v1749_v26 }
 0x1fe   :  { %v1362_v29 = vpop.f32.mrf.mxu1 }
 0x1ff   :  { %v1169_v30 = vpack.c.bf16 %v1065_v28, %v1064_v27  ;;  %v1363_v34 = vadd.f32 %v3174_v36, %v1362_v29 }
 0x200   :  { %v3320_v31 = vpop.f32.mrf.mxu2 }
 0x201   :  { %1401 = vmatmul.bf16.gmra.mxu1 %v1169_v30  ;;  %v1637_v40 = vmax.f32 %v1363_v34, 0.0  ;;  %v2872_v34 = vld [vmem:[%s4215_s1 + $0x118] sm:$0xff] }
 0x202   :  { %v818_v33 = vpop.f32.mrf.mxu0 }
 0x203   :  { %v819_v41 = vadd.f32 %v3094_v19, %v818_v33 }
 0x205   :  { %2725 = vmatmul.msk.bf16.gmra.mxu0 %vm496_vm0, %v2869_v32  ;;  %v1066_v47 = vmax.f32 %v819_v41, 0.0 }
 0x206   :  { %v1364_v35 = vpop.f32.mrf.mxu1 }
 0x207   :  { %v1365_v38 = vadd.f32 %v3174_v36, %v1364_v35 }
 0x208   :  { %v3328_v39 = vpop.f32.mrf.mxu2 }
 0x209   :  { %v1638_v42 = vmax.f32 %v1365_v38, 0.0 }
 0x20a   :  { %v820_v44 = vpop.f32.mrf.mxu0 }
 0x20b   :  { %v821_v45 = vadd.f32 %v3094_v19, %v820_v44  ;;  %v1750_v46 = vpack.c.bf16 %v1638_v42, %v1637_v40 }
 0x20d   :  { %v1067_v49 = vmax.f32 %v821_v45, 0.0  ;;  %1950 = vmatmul.bf16.gmra.mxu2 %v1750_v46 }
 0x20e   :  { %v1367_v50 = vpop.f32.mrf.mxu1 }
 0x20f   :  { %v1170_v51 = vpack.c.bf16 %v1067_v49, %v1066_v47  ;;  %v1368_v57 = vadd.f32 %v3174_v36, %v1367_v50 }
 0x210   :  { %v3332_v52 = vpop.f32.mrf.mxu2 }
 0x211   :  { %1406 = vmatmul.bf16.gmra.mxu1 %v1170_v51  ;;  %v1639_v61 = vmax.f32 %v1368_v57, 0.0 }
 0x212   :  { %v823_v55 = vpop.f32.mrf.mxu0 }
 0x213   :  { %v824_v63 = vadd.f32 %v3094_v19, %v823_v55 }
 0x215   :  { %2726 = vmatmul.msk.bf16.gmra.mxu0 %vm496_vm0, %v2870_v53  ;;  %v1068_v5 = vmax.f32 %v824_v63, 0.0 }
 0x216   :  { %v1369_v58 = vpop.f32.mrf.mxu1 }
 0x217   :  { %v1370_v59 = vadd.f32 %v3174_v36, %v1369_v58 }
 0x218   :  { %v3340_v60 = vpop.f32.mrf.mxu2 }
 0x219   :  { %v1640_v0 = vmax.f32 %v1370_v59, 0.0  ;;  %v2873_v59 = vld [vmem:[%s4215_s1 + $0x120] sm:$0xff] }
 0x21a   :  { %v825_v2 = vpop.f32.mrf.mxu0 }
 0x21b   :  { %v826_v3 = vadd.f32 %v3094_v19, %v825_v2  ;;  %v1751_v4 = vpack.c.bf16 %v1640_v0, %v1639_v61 }
 0x21d   :  { %v1069_v6 = vmax.f32 %v826_v3, 0.0  ;;  %1955 = vmatmul.bf16.gmra.mxu2 %v1751_v4 }
 0x21e   :  { %v1372_v8 = vpop.f32.mrf.mxu1 }
 0x21f   :  { %v1171_v9 = vpack.c.bf16 %v1069_v6, %v1068_v5  ;;  %v1373_v14 = vadd.f32 %v3174_v36, %v1372_v8 }
 0x220   :  { %v3344_v10 = vpop.f32.mrf.mxu2 }
 0x221   :  { %1411 = vmatmul.bf16.gmra.mxu1 %v1171_v9  ;;  %v1641_v21 = vmax.f32 %v1373_v14, 0.0 }
 0x222   :  { %v828_v13 = vpop.f32.mrf.mxu0 }
 0x223   :  { %v829_v22 = vadd.f32 %v3094_v19, %v828_v13 }
 0x225   :  { %2727 = vmatmul.msk.bf16.gmra.mxu0 %vm496_vm0, %v2871_v12  ;;  %v1070_v28 = vmax.f32 %v829_v22, 0.0  ;;  %v2874_v22 = vld [vmem:[%s4215_s1 + $0x128] sm:$0xff] }
 0x226   :  { %v1374_v15 = vpop.f32.mrf.mxu1 }
 0x227   :  { %v1375_v16 = vadd.f32 %v3174_v36, %v1374_v15 }
 0x228   :  { %v3352_v20 = vpop.f32.mrf.mxu2 }
 0x229   :  { %v1642_v23 = vmax.f32 %v1375_v16, 0.0 }
 0x22a   :  { %v830_v24 = vpop.f32.mrf.mxu0 }
 0x22b   :  { %v831_v26 = vadd.f32 %v3094_v19, %v830_v24  ;;  %v1752_v27 = vpack.c.bf16 %v1642_v23, %v1641_v21 }
 0x22d   :  { %v1071_v29 = vmax.f32 %v831_v26, 0.0  ;;  %1960 = vmatmul.bf16.gmra.mxu2 %v1752_v27 }
 0x22e   :  { %v1377_v30 = vpop.f32.mrf.mxu1 }
 0x22f   :  { %v1172_v32 = vpack.c.bf16 %v1071_v29, %v1070_v28  ;;  %v1378_v38 = vadd.f32 %v3174_v36, %v1377_v30 }
 0x230   :  { %v3356_v33 = vpop.f32.mrf.mxu2 }
 0x231   :  { %1416 = vmatmul.bf16.gmra.mxu1 %v1172_v32  ;;  %v1643_v44 = vmax.f32 %v1378_v38, 0.0 }
 0x232   :  { %v833_v35 = vpop.f32.mrf.mxu0 }
 0x233   :  { %v834_v45 = vadd.f32 %v3094_v19, %v833_v35 }
 0x235   :  { %2728 = vmatmul.msk.bf16.gmra.mxu0 %vm496_vm0, %v2872_v34  ;;  %v1072_v51 = vmax.f32 %v834_v45, 0.0 }
 0x236   :  { %v1379_v40 = vpop.f32.mrf.mxu1 }
 0x237   :  { %v1380_v41 = vadd.f32 %v3174_v36, %v1379_v40 }
 0x238   :  { %v3364_v42 = vpop.f32.mrf.mxu2 }
 0x239   :  { %v1644_v46 = vmax.f32 %v1380_v41, 0.0 }
 0x23a   :  { %v835_v47 = vpop.f32.mrf.mxu0 }
 0x23b   :  { %v836_v49 = vadd.f32 %v3094_v19, %v835_v47  ;;  %v1753_v50 = vpack.c.bf16 %v1644_v46, %v1643_v44  ;;  %v2875_v47 = vld [vmem:[%s4215_s1 + $0x130] sm:$0xff] }
 0x23d   :  { %v1073_v53 = vmax.f32 %v836_v49, 0.0  ;;  %1965 = vmatmul.bf16.gmra.mxu2 %v1753_v50 }
 0x23e   :  { %v1382_v55 = vpop.f32.mrf.mxu1 }
 0x23f   :  { %v1173_v57 = vpack.c.bf16 %v1073_v53, %v1072_v51  ;;  %v1383_v63 = vadd.f32 %v3174_v36, %v1382_v55 }
 0x240   :  { %v3368_v58 = vpop.f32.mrf.mxu2 }
 0x241   :  { %1421 = vmatmul.bf16.gmra.mxu1 %v1173_v57  ;;  %v1645_v4 = vmax.f32 %v1383_v63, 0.0  ;;  %v3405_v57 = vld [vmem:[%s4217_s3] ss:$0 sm:$0xff] }
 0x242   :  { %v838_v61 = vpop.f32.mrf.mxu0 }
 0x243   :  { %v839_v5 = vadd.f32 %v3094_v19, %v838_v61 }
 0x245   :  { %2729 = vmatmul.msk.bf16.gmra.mxu0 %vm496_vm0, %v2873_v59  ;;  %v1074_v13 = vmax.f32 %v839_v5, 0.0 }
 0x246   :  { %v1384_v0 = vpop.f32.mrf.mxu1 }
 0x247   :  { %v1385_v2 = vadd.f32 %v3174_v36, %v1384_v0 }
 0x248   :  { %v3376_v3 = vpop.f32.mrf.mxu2 }
 0x249   :  { %v1646_v6 = vmax.f32 %v1385_v2, 0.0 }
 0x24a   :  { %v840_v8 = vpop.f32.mrf.mxu0 }
 0x24b   :  { %v841_v9 = vadd.f32 %v3094_v19, %v840_v8  ;;  %v1754_v12 = vpack.c.bf16 %v1646_v6, %v1645_v4 }
 0x24d   :  { %v1075_v14 = vmax.f32 %v841_v9, 0.0  ;;  %1970 = vmatmul.bf16.gmra.mxu2 %v1754_v12  ;;  %v2876_v12 = vld [vmem:[%s4215_s1 + $0x138] sm:$0xff] }
 0x24e   :  { %v1387_v15 = vpop.f32.mrf.mxu1 }
 0x24f   :  { %v1174_v16 = vpack.c.bf16 %v1075_v14, %v1074_v13  ;;  %v1388_v24 = vadd.f32 %v3174_v36, %v1387_v15 }
 0x250   :  { %v3380_v21 = vpop.f32.mrf.mxu2 }
 0x251   :  { %1426 = vmatmul.bf16.gmra.mxu1 %v1174_v16  ;;  %v1647_v29 = vmax.f32 %v1388_v24, 0.0 }
 0x252   :  { %v843_v23 = vpop.f32.mrf.mxu0 }
 0x253   :  { %v844_v30 = vadd.f32 %v3094_v19, %v843_v23 }
 0x255   :  { %2730 = vmatmul.msk.bf16.gmra.mxu0 %vm496_vm0, %v2874_v22  ;;  %v1076_v40 = vmax.f32 %v844_v30, 0.0 }
 0x256   :  { %v1389_v26 = vpop.f32.mrf.mxu1 }
 0x257   :  { %v1390_v27 = vadd.f32 %v3174_v36, %v1389_v26 }
 0x258   :  { %v3388_v28 = vpop.f32.mrf.mxu2 }
 0x259   :  { %v1648_v32 = vmax.f32 %v1390_v27, 0.0 }
 0x25a   :  { %v845_v34 = vpop.f32.mrf.mxu0 }
 0x25b   :  { %v846_v35 = vadd.f32 %v3094_v19, %v845_v34  ;;  %v1755_v38 = vpack.c.bf16 %v1648_v32, %v1647_v29 }
 0x25d   :  { %v1077_v41 = vmax.f32 %v846_v35, 0.0  ;;  %1975 = vmatmul.bf16.gmra.mxu2 %v1755_v38 }
 0x25e   :  { %v1392_v44 = vpop.f32.mrf.mxu1 }
 0x25f   :  { %v1175_v45 = vpack.c.bf16 %v1077_v41, %v1076_v40  ;;  %v1393_v50 = vadd.f32 %v3174_v36, %v1392_v44  ;;  %v2877_v41 = vld [vmem:[%s4215_s1 + $0x140] sm:$0xff] }
 0x260   :  { %v3392_v46 = vpop.f32.mrf.mxu2 }
 0x261   :  { %1431 = vmatmul.bf16.gmra.mxu1 %v1175_v45  ;;  %v1649_v55 = vmax.f32 %v1393_v50, 0.0 }
 0x262   :  { %v848_v49 = vpop.f32.mrf.mxu0 }
 0x263   :  { %v849_v59 = vadd.f32 %v3405_v57, %v848_v49 }
 0x265   :  { %2731 = vmatmul.msk.bf16.gmra.mxu0 %vm496_vm0, %v2875_v47  ;;  %v1078_v4 = vmax.f32 %v849_v59, 0.0 }
 0x266   :  { %v1394_v51 = vpop.f32.mrf.mxu1 }
 0x267   :  { %v1395_v19 = vadd.f32 %v3174_v36, %v1394_v51 }
 0x268   :  { %v3400_v53 = vpop.f32.mrf.mxu2 }
 0x269   :  { %v1650_v61 = vmax.f32 %v1395_v19, 0.0 }
 0x26a   :  { %v850_v63 = vpop.f32.mrf.mxu0 }
 0x26b   :  { %v851_v0 = vadd.f32 %v3405_v57, %v850_v63  ;;  %v1756_v2 = vpack.c.bf16 %v1650_v61, %v1649_v55 }
 0x26d   :  { %v1079_v5 = vmax.f32 %v851_v0, 0.0  ;;  %1980 = vmatmul.bf16.gmra.mxu2 %v1756_v2 }
 0x26e   :  { %v1397_v6 = vpop.f32.mrf.mxu1 }
 0x26f   :  { %v1176_v8 = vpack.c.bf16 %v1079_v5, %v1078_v4  ;;  %v1398_v14 = vadd.f32 %v3174_v36, %v1397_v6 }
 0x270   :  { %v3409_v9 = vpop.f32.mrf.mxu2 }
 0x271   :  { %1436 = vmatmul.bf16.gmra.mxu1 %v1176_v8  ;;  %v1651_v23 = vmax.f32 %v1398_v14, 0.0  ;;  %v2878_v8 = vld [vmem:[%s4215_s1 + $0x148] sm:$0xff] }
 0x272   :  { %v853_v13 = vpop.f32.mrf.mxu0 }
 0x273   :  { %v854_v24 = vadd.f32 %v3405_v57, %v853_v13 }
 0x275   :  { %2732 = vmatmul.msk.bf16.gmra.mxu0 %vm496_vm0, %v2876_v12  ;;  %v1080_v32 = vmax.f32 %v854_v24, 0.0 }
 0x276   :  { %v1399_v15 = vpop.f32.mrf.mxu1 }
 0x277   :  { %v1400_v16 = vadd.f32 %v3174_v36, %v1399_v15 }
 0x278   :  { %v3417_v22 = vpop.f32.mrf.mxu2 }
 0x279   :  { %v1652_v26 = vmax.f32 %v1400_v16, 0.0 }
 0x27a   :  { %v855_v27 = vpop.f32.mrf.mxu0 }
 0x27b   :  { %v856_v29 = vadd.f32 %v3405_v57, %v855_v27  ;;  %v1757_v30 = vpack.c.bf16 %v1652_v26, %v1651_v23 }
 0x27d   :  { %v1081_v34 = vmax.f32 %v856_v29, 0.0  ;;  %1985 = vmatmul.bf16.gmra.mxu2 %v1757_v30 }
 0x27e   :  { %v1402_v35 = vpop.f32.mrf.mxu1 }
 0x27f   :  { %v1177_v38 = vpack.c.bf16 %v1081_v34, %v1080_v32  ;;  %v1403_v45 = vadd.f32 %v3174_v36, %v1402_v35 }
 0x280   :  { %v3421_v40 = vpop.f32.mrf.mxu2 }
 0x281   :  { %1441 = vmatmul.bf16.gmra.mxu1 %v1177_v38  ;;  %v1653_v51 = vmax.f32 %v1403_v45, 0.0 }
 0x282   :  { %v858_v44 = vpop.f32.mrf.mxu0 }
 0x283   :  { %v859_v19 = vadd.f32 %v3405_v57, %v858_v44  ;;  %v2879_v44 = vld [vmem:[%s4215_s1 + $0x150] sm:$0xff] }
 0x285   :  { %2733 = vmatmul.msk.bf16.gmra.mxu0 %vm496_vm0, %v2877_v41  ;;  %v1082_v0 = vmax.f32 %v859_v19, 0.0 }
 0x286   :  { %v1404_v47 = vpop.f32.mrf.mxu1 }
 0x287   :  { %v1405_v49 = vadd.f32 %v3174_v36, %v1404_v47 }
 0x288   :  { %v3429_v50 = vpop.f32.mrf.mxu2 }
 0x289   :  { %v1654_v55 = vmax.f32 %v1405_v49, 0.0 }
 0x28a   :  { %v860_v59 = vpop.f32.mrf.mxu0 }
 0x28b   :  { %v861_v61 = vadd.f32 %v3405_v57, %v860_v59  ;;  %v1758_v63 = vpack.c.bf16 %v1654_v55, %v1653_v51 }
 0x28d   :  { %v1083_v2 = vmax.f32 %v861_v61, 0.0  ;;  %1990 = vmatmul.bf16.gmra.mxu2 %v1758_v63 }
 0x28e   :  { %v1407_v4 = vpop.f32.mrf.mxu1 }
 0x28f   :  { %v1178_v5 = vpack.c.bf16 %v1083_v2, %v1082_v0  ;;  %v1408_v13 = vadd.f32 %v3174_v36, %v1407_v4 }
 0x290   :  { %v3433_v6 = vpop.f32.mrf.mxu2 }
 0x291   :  { %1446 = vmatmul.bf16.gmra.mxu1 %v1178_v5  ;;  %v1655_v23 = vmax.f32 %v1408_v13, 0.0 }
 0x292   :  { %v863_v12 = vpop.f32.mrf.mxu0 }
 0x293   :  { %v864_v24 = vadd.f32 %v3405_v57, %v863_v12 }
 0x295   :  { %2734 = vmatmul.msk.bf16.gmra.mxu0 %vm496_vm0, %v2878_v8  ;;  %v1084_v32 = vmax.f32 %v864_v24, 0.0 }
 0x296   :  { %v1409_v14 = vpop.f32.mrf.mxu1 }
 0x297   :  { %v1410_v15 = vadd.f32 %v3174_v36, %v1409_v14  ;;  %v2880_v14 = vld [vmem:[%s4215_s1 + $0x158] sm:$0xff] }
 0x298   :  { %v3441_v16 = vpop.f32.mrf.mxu2 }
 0x299   :  { %v1656_v26 = vmax.f32 %v1410_v15, 0.0 }
 0x29a   :  { %v865_v27 = vpop.f32.mrf.mxu0 }
 0x29b   :  { %v866_v29 = vadd.f32 %v3405_v57, %v865_v27  ;;  %v1759_v30 = vpack.c.bf16 %v1656_v26, %v1655_v23 }
 0x29d   :  { %v1085_v34 = vmax.f32 %v866_v29, 0.0  ;;  %1995 = vmatmul.bf16.gmra.mxu2 %v1759_v30 }
 0x29e   :  { %v1412_v35 = vpop.f32.mrf.mxu1 }
 0x29f   :  { %v1179_v38 = vpack.c.bf16 %v1085_v34, %v1084_v32  ;;  %v1413_v47 = vadd.f32 %v3174_v36, %v1412_v35 }
 0x2a0   :  { %v3445_v41 = vpop.f32.mrf.mxu2 }
 0x2a1   :  { %4223 = vst [vmem:[#allocation5_spill] sm:$0xff] %v3445_v41  ;;  %1451 = vmatmul.bf16.gmra.mxu1 %v1179_v38  ;;  %v1657_v55 = vmax.f32 %v1413_v47, 0.0 }
 0x2a2   :  { %v868_v45 = vpop.f32.mrf.mxu0 }
 0x2a3   :  { %v869_v59 = vadd.f32 %v3405_v57, %v868_v45 }
 0x2a5   :  { %2735 = vmatmul.msk.bf16.gmra.mxu0 %vm496_vm0, %v2879_v44  ;;  %v1086_v4 = vmax.f32 %v869_v59, 0.0  ;;  %v3477_v59 = vld [vmem:[%s4219_s5] ss:$0 sm:$0xff] }
 0x2a6   :  { %v1414_v49 = vpop.f32.mrf.mxu1 }
 0x2a7   :  { %v1415_v51 = vadd.f32 %v3174_v36, %v1414_v49 }
 0x2a8   :  { %v3453_v19 = vpop.f32.mrf.mxu2 }
 0x2a9   :  { %4224 = vst [vmem:[#allocation6_spill] sm:$0xff] %v3453_v19  ;;  %v1658_v61 = vmax.f32 %v1415_v51, 0.0 }
 0x2aa   :  { %v870_v63 = vpop.f32.mrf.mxu0 }
 0x2ab   :  { %v871_v0 = vadd.f32 %v3405_v57, %v870_v63  ;;  %v1760_v2 = vpack.c.bf16 %v1658_v61, %v1657_v55 }
 0x2ad   :  { %v1087_v5 = vmax.f32 %v871_v0, 0.0  ;;  %2000 = vmatmul.bf16.gmra.mxu2 %v1760_v2 }
 0x2ae   :  { %v1417_v8 = vpop.f32.mrf.mxu1 }
 0x2af   :  { %v1180_v12 = vpack.c.bf16 %v1087_v5, %v1086_v4  ;;  %v1418_v23 = vadd.f32 %v3174_v36, %v1417_v8 }
 0x2b0   :  { %v3457_v13 = vpop.f32.mrf.mxu2 }
 0x2b1   :  { %4225 = vst [vmem:[#allocation7_spill] sm:$0xff] %v3457_v13  ;;  %1456 = vmatmul.bf16.gmra.mxu1 %v1180_v12  ;;  %v1659_v29 = vmax.f32 %v1418_v23, 0.0 }
 0x2b2   :  { %v873_v15 = vpop.f32.mrf.mxu0 }
 0x2b3   :  { %v874_v30 = vadd.f32 %v3405_v57, %v873_v15 }
 0x2b5   :  { %2736 = vmatmul.msk.bf16.gmra.mxu0 %vm496_vm0, %v2880_v14  ;;  %v1088_v44 = vmax.f32 %v874_v30, 0.0 }
 0x2b6   :  { %v1419_v24 = vpop.f32.mrf.mxu1 }
 0x2b7   :  { %v1420_v26 = vadd.f32 %v3174_v36, %v1419_v24  ;;  %v2881_v36 = vld [vmem:[%s4215_s1 + $0x160] sm:$0xff] }
 0x2b8   :  { %v3465_v27 = vpop.f32.mrf.mxu2 }
 0x2b9   :  { %4226 = vst [vmem:[#allocation8_spill] sm:$0xff] %v3465_v27  ;;  %v1660_v32 = vmax.f32 %v1420_v26, 0.0 }
 0x2ba   :  { %v875_v34 = vpop.f32.mrf.mxu0 }
 0x2bb   :  { %v876_v35 = vadd.f32 %v3405_v57, %v875_v34  ;;  %v1761_v38 = vpack.c.bf16 %v1660_v32, %v1659_v29  ;;  %v2882_v32 = vld [vmem:[%s4215_s1 + $0x168] sm:$0xff] }
 0x2bd   :  { %v1089_v45 = vmax.f32 %v876_v35, 0.0  ;;  %2005 = vmatmul.bf16.gmra.mxu2 %v1761_v38 }
 0x2be   :  { %v1422_v47 = vpop.f32.mrf.mxu1 }
 0x2bf   :  { %v1181_v49 = vpack.c.bf16 %v1089_v45, %v1088_v44  ;;  %v1423_v61 = vadd.f32 %v3477_v59, %v1422_v47 }
 0x2c0   :  { %v3469_v51 = vpop.f32.mrf.mxu2 }
 0x2c1   :  { %4227 = vst [vmem:[#allocation9_spill] sm:$0xff] %v3469_v51  ;;  %1461 = vmatmul.bf16.gmra.mxu1 %v1181_v49  ;;  %v1661_v4 = vmax.f32 %v1423_v61, 0.0 }
 0x2c2   :  { %v878_v55 = vpop.f32.mrf.mxu0 }
 0x2c3   :  { %v879_v5 = vadd.f32 %v3405_v57, %v878_v55 }
 0x2c5   :  { %2737 = vmatmul.msk.bf16.gmra.mxu0 %vm496_vm0, %v2881_v36  ;;  %v1090_v23 = vmax.f32 %v879_v5, 0.0 }
 0x2c6   :  { %v1424_v63 = vpop.f32.mrf.mxu1 }
 0x2c7   :  { %v1425_v0 = vadd.f32 %v3477_v59, %v1424_v63 }
 0x2c8   :  { %v3482_v2 = vpop.f32.mrf.mxu2 }
 0x2c9   :  { %4228 = vst [vmem:[#allocation10_spill] sm:$0xff] %v3482_v2  ;;  %v1662_v8 = vmax.f32 %v1425_v0, 0.0 }
 0x2ca   :  { %v880_v12 = vpop.f32.mrf.mxu0 }
 0x2cb   :  { %v881_v14 = vadd.f32 %v3405_v57, %v880_v12  ;;  %v1762_v15 = vpack.c.bf16 %v1662_v8, %v1661_v4 }
 0x2cd   :  { %v1091_v24 = vmax.f32 %v881_v14, 0.0  ;;  %2010 = vmatmul.bf16.gmra.mxu2 %v1762_v15  ;;  %v2883_v14 = vld [vmem:[%s4215_s1 + $0x170] sm:$0xff] }
 0x2ce   :  { %v1427_v26 = vpop.f32.mrf.mxu1 }
 0x2cf   :  { %v1182_v29 = vpack.c.bf16 %v1091_v24, %v1090_v23  ;;  %v1428_v35 = vadd.f32 %v3477_v59, %v1427_v26 }
 0x2d0   :  { %v3486_v30 = vpop.f32.mrf.mxu2 }
 0x2d1   :  { %4229 = vst [vmem:[#allocation11_spill] sm:$0xff] %v3486_v30  ;;  %1466 = vmatmul.bf16.gmra.mxu1 %v1182_v29  ;;  %v1663_v47 = vmax.f32 %v1428_v35, 0.0 }
 0x2d2   :  { %v883_v34 = vpop.f32.mrf.mxu0 }
 0x2d3   :  { %v884_v49 = vadd.f32 %v3405_v57, %v883_v34 }
 0x2d5   :  { %2738 = vmatmul.msk.bf16.gmra.mxu0 %vm496_vm0, %v2882_v32  ;;  %v1092_v0 = vmax.f32 %v884_v49, 0.0 }
 0x2d6   :  { %v1429_v38 = vpop.f32.mrf.mxu1 }
 0x2d7   :  { %v1430_v44 = vadd.f32 %v3477_v59, %v1429_v38 }
 0x2d8   :  { %v3494_v45 = vpop.f32.mrf.mxu2 }
 0x2d9   :  { %4230 = vst [vmem:[#allocation12_spill] sm:$0xff] %v3494_v45  ;;  %v1664_v36 = vmax.f32 %v1430_v44, 0.0 }
 0x2da   :  { %v885_v55 = vpop.f32.mrf.mxu0 }
 0x2db   :  { %v886_v61 = vadd.f32 %v3405_v57, %v885_v55  ;;  %v1763_v63 = vpack.c.bf16 %v1664_v36, %v1663_v47 }
 0x2dd   :  { %v1093_v4 = vmax.f32 %v886_v61, 0.0  ;;  %2015 = vmatmul.bf16.gmra.mxu2 %v1763_v63 }
 0x2de   :  { %v1432_v5 = vpop.f32.mrf.mxu1 }
 0x2df   :  { %v1183_v8 = vpack.c.bf16 %v1093_v4, %v1092_v0  ;;  %v1433_v23 = vadd.f32 %v3477_v59, %v1432_v5  ;;  %v2884_v0 = vld [vmem:[%s4215_s1 + $0x178] sm:$0xff] }
 0x2e0   :  { %v3498_v12 = vpop.f32.mrf.mxu2 }
 0x2e1   :  { %4231 = vst [vmem:[#allocation13_spill] sm:$0xff] %v3498_v12  ;;  %1471 = vmatmul.bf16.gmra.mxu1 %v1183_v8  ;;  %v1665_v32 = vmax.f32 %v1433_v23, 0.0 }
 0x2e2   :  { %v888_v15 = vpop.f32.mrf.mxu0 }
 0x2e3   :  { %v889_v34 = vadd.f32 %v3405_v57, %v888_v15  ;;  %v2890_v15 = vld [vmem:[%s4215_s1 + $0x1a8] sm:$0xff] }
 0x2e4   :  { %2746 = vmatmul.msk.bf16.vlgmr.msra.gmra.mxu3 %vm496_vm0, %v2890_v15 }
 0x2e5   :  { %2739 = vmatmul.msk.bf16.gmra.mxu0 %vm496_vm0, %v2883_v14  ;;  %v1094_v49 = vmax.f32 %v889_v34, 0.0 }
 0x2e6   :  { %v1434_v24 = vpop.f32.mrf.mxu1 }
 0x2e7   :  { %v1435_v26 = vadd.f32 %v3477_v59, %v1434_v24 }
 0x2e8   :  { %v3506_v29 = vpop.f32.mrf.mxu2 }
 0x2e9   :  { %4232 = vst [vmem:[#allocation14_spill] sm:$0xff] %v3506_v29  ;;  %v1666_v35 = vmax.f32 %v1435_v26, 0.0 }
 0x2ea   :  { %v890_v38 = vpop.f32.mrf.mxu0 }
 0x2eb   :  { %v891_v44 = vadd.f32 %v3405_v57, %v890_v38  ;;  %v1764_v47 = vpack.c.bf16 %v1666_v35, %v1665_v32  ;;  %v2945_v35 = vld [vmem:[%s4220_s6 + $0x38] sm:$0xff] }
 0x2ec   :  { %2927 = vmatpush.bf16.msra.mxu3 %v2945_v35 }
 0x2ed   :  { %v1095_v36 = vmax.f32 %v891_v44, 0.0  ;;  %2020 = vmatmul.bf16.gmra.mxu2 %v1764_v47 }
 0x2ee   :  { %v1437_v55 = vpop.f32.mrf.mxu1 }
 0x2ef   :  { %v1184_v61 = vpack.c.bf16 %v1095_v36, %v1094_v49  ;;  %v1438_v5 = vadd.f32 %v3477_v59, %v1437_v55  ;;  %v2946_v55 = vld [vmem:[%s4220_s6 + $0x30] sm:$0xff] }
 0x2f0   :  { %v3510_v63 = vpop.f32.mrf.mxu2  ;;  %2928 = vmatpush.bf16.msra.mxu3 %v2946_v55 }
 0x2f1   :  { %1476 = vmatmul.bf16.gmra.mxu1 %v1184_v61  ;;  %v1667_v24 = vmax.f32 %v1438_v5, 0.0 }
 0x2f2   :  { %v893_v4 = vpop.f32.mrf.mxu0 }
 0x2f3   :  { %v894_v26 = vadd.f32 %v3405_v57, %v893_v4  ;;  %v2885_v4 = vld [vmem:[%s4215_s1 + $0x180] sm:$0xff] }
 0x2f5   :  { %2740 = vmatmul.msk.bf16.gmra.mxu0 %vm496_vm0, %v2884_v0  ;;  %v1096_v47 = vmax.f32 %v894_v26, 0.0 }
 0x2f6   :  { %v1439_v8 = vpop.f32.mrf.mxu1 }
 0x2f7   :  { %v1440_v14 = vadd.f32 %v3477_v59, %v1439_v8  ;;  %v2947_v8 = vld [vmem:[%s4220_s6 + $0x28] sm:$0xff] }
 0x2f8   :  { %v3521_v23 = vpop.f32.mrf.mxu2  ;;  %2929 = vmatpush.bf16.msra.mxu3 %v2947_v8 }
 0x2f9   :  { %v1668_v32 = vmax.f32 %v1440_v14, 0.0 }
 0x2fa   :  { %v895_v34 = vpop.f32.mrf.mxu0 }
 0x2fb   :  { %v896_v38 = vadd.f32 %v3405_v57, %v895_v34  ;;  %v1765_v44 = vpack.c.bf16 %v1668_v32, %v1667_v24  ;;  %v2948_v24 = vld [vmem:[%s4220_s6 + $0x20] sm:$0xff]  ;;  %v2891_v32 = vld [vmem:[%s4215_s1 + $0x1b0] sm:$0xff] }
 0x2fc   :  { %2930 = vmatpush.bf16.msra.mxu3 %v2948_v24  ;;  %v2886_v24 = vld [vmem:[%s4215_s1 + $0x188] sm:$0xff] }
 0x2fd   :  { %v1097_v49 = vmax.f32 %v896_v38, 0.0  ;;  %2025 = vmatmul.bf16.gmra.mxu2 %v1765_v44  ;;  %2747 = vmatmul.msk.bf16.gmra.mxu3 %vm496_vm0, %v2891_v32  ;;  %v2951_v32 = vld [vmem:[%s4220_s6 + $0x8] sm:$0xff] }
 0x2fe   :  { %v1442_v36 = vpop.f32.mrf.mxu1 }
 0x2ff   :  { %v1185_v61 = vpack.c.bf16 %v1097_v49, %v1096_v47  ;;  %v1443_v14 = vadd.f32 %v3477_v59, %v1442_v36  ;;  %v2949_v49 = vld [vmem:[%s4220_s6 + $0x18] sm:$0xff] }
 0x300   :  { %v3532_v0 = vpop.f32.mrf.mxu2  ;;  %2931 = vmatpush.bf16.msra.mxu3 %v2949_v49  ;;  %v2892_v49 = vld [vmem:[%s4215_s1 + $0x1b8] sm:$0xff] }
 0x301   :  { %1481 = vmatmul.bf16.gmra.mxu1 %v1185_v61  ;;  %v1669_v35 = vmax.f32 %v1443_v14, 0.0 }
 0x302   :  { %v898_v5 = vpop.f32.mrf.mxu0 }
 0x303   :  { %v899_v38 = vadd.f32 %v3405_v57, %v898_v5  ;;  %v2950_v5 = vld [vmem:[%s4220_s6 + $0x10] sm:$0xff] }
 0x304   :  { %2932 = vmatpush.bf16.msra.mxu3 %v2950_v5 }
 0x305   :  { %2741 = vmatmul.msk.bf16.gmra.mxu0 %vm496_vm0, %v2885_v4  ;;  %v1098_v61 = vmax.f32 %v899_v38, 0.0 }
 0x306   :  { %v1444_v15 = vpop.f32.mrf.mxu1 }
 0x307   :  { %v1445_v26 = vadd.f32 %v3477_v59, %v1444_v15 }
 0x308   :  { %v3549_v34 = vpop.f32.mrf.mxu2  ;;  %2933 = vmatpush.bf16.msra.mxu3 %v2951_v32 }
 0x309   :  { %v1670_v44 = vmax.f32 %v1445_v26, 0.0 }
 0x30a   :  { %v900_v47 = vpop.f32.mrf.mxu0 }
 0x30b   :  { %v901_v36 = vadd.f32 %v3405_v57, %v900_v47  ;;  %v1766_v55 = vpack.c.bf16 %v1670_v44, %v1669_v35  ;;  %v2952_v44 = vld [vmem:[%s4220_s6] sm:$0xff] }
 0x30c   :  { %2934 = vmatpush.bf16.msra.mxu3 %v2952_v44 }
 0x30d   :  { %v1099_v4 = vmax.f32 %v901_v36, 0.0  ;;  %2030 = vmatmul.bf16.gmra.mxu2 %v1766_v55  ;;  %2748 = vmatmul.msk.bf16.gmra.mxu3 %vm496_vm0, %v2892_v49 }
 0x30e   :  { %v1447_v8 = vpop.f32.mrf.mxu1 }
 0x30f   :  { %v1186_v14 = vpack.c.bf16 %v1099_v4, %v1098_v61  ;;  %v1448_v35 = vadd.f32 %v3477_v59, %v1447_v8 }
 0x310   :  { %v3560_v15 = vpop.f32.mrf.mxu2 }
 0x311   :  { %1486 = vmatmul.bf16.gmra.mxu1 %v1186_v14  ;;  %v1671_v55 = vmax.f32 %v1448_v35, 0.0  ;;  %v2887_v35 = vld [vmem:[%s4215_s1 + $0x190] sm:$0xff] }
 0x312   :  { %v903_v26 = vpop.f32.mrf.mxu0 }
 0x313   :  { %v904_v61 = vadd.f32 %v3405_v57, %v903_v26 }
 0x315   :  { %2742 = vmatmul.msk.bf16.gmra.mxu0 %vm496_vm0, %v2886_v24  ;;  %v1100_v24 = vmax.f32 %v904_v61, 0.0  ;;  %v2893_v61 = vld [vmem:[%s4215_s1 + $0x1c0] sm:$0xff] }
 0x316   :  { %v1449_v38 = vpop.f32.mrf.mxu1 }
 0x317   :  { %v1450_v47 = vadd.f32 %v3477_v59, %v1449_v38 }
 0x318   :  { %v3577_v36 = vpop.f32.mrf.mxu2 }
 0x319   :  { %v1672_v4 = vmax.f32 %v1450_v47, 0.0 }
 0x31a   :  { %v905_v8 = vpop.f32.mrf.mxu0 }
 0x31b   :  { %v906_v5 = vadd.f32 %v3405_v57, %v905_v8  ;;  %v1767_v14 = vpack.c.bf16 %v1672_v4, %v1671_v55 }
 0x31d   :  { %v1101_v32 = vmax.f32 %v906_v5, 0.0  ;;  %2035 = vmatmul.bf16.gmra.mxu2 %v1767_v14  ;;  %2749 = vmatmul.msk.bf16.gmra.mxu3 %vm496_vm0, %v2893_v61 }
 0x31e   :  { %v1452_v38 = vpop.f32.mrf.mxu1 }
 0x31f   :  { %v1187_v44 = vpack.c.bf16 %v1101_v32, %v1100_v24  ;;  %v1453_v47 = vadd.f32 %v3477_v59, %v1452_v38 }
 0x320   :  { %v3582_v41 = vpop.f32.mrf.mxu2 }
 0x321   :  { %4233 = vst [vmem:[#allocation15_spill] sm:$0xff] %v3582_v41  ;;  %1491 = vmatmul.bf16.gmra.mxu1 %v1187_v44  ;;  %v1673_v8 = vmax.f32 %v1453_v47, 0.0  ;;  %v2888_v47 = vld [vmem:[%s4215_s1 + $0x198] sm:$0xff] }
 0x322   :  { %v908_v26 = vpop.f32.mrf.mxu0 }
 0x323   :  { %v909_v5 = vadd.f32 %v3405_v57, %v908_v26 }
 0x325   :  { %2743 = vmatmul.msk.bf16.gmra.mxu0 %vm496_vm0, %v2887_v35  ;;  %v1102_v44 = vmax.f32 %v909_v5, 0.0  ;;  %v2894_v5 = vld [vmem:[%s4215_s1 + $0x1c8] sm:$0xff] }
 0x326   :  { %v1454_v49 = vpop.f32.mrf.mxu1 }
 0x327   :  { %v1455_v55 = vadd.f32 %v3477_v59, %v1454_v49 }
 0x328   :  { %v3593_v4 = vpop.f32.mrf.mxu2 }
 0x329   :  { %4234 = vst [vmem:[#allocation16_spill] sm:$0xff] %v3593_v4  ;;  %v1674_v14 = vmax.f32 %v1455_v55, 0.0 }
 0x32a   :  { %v910_v24 = vpop.f32.mrf.mxu0 }
 0x32b   :  { %v911_v32 = vadd.f32 %v3405_v57, %v910_v24  ;;  %v1768_v38 = vpack.c.bf16 %v1674_v14, %v1673_v8 }
 0x32d   :  { %v1103_v35 = vmax.f32 %v911_v32, 0.0  ;;  %2040 = vmatmul.bf16.gmra.mxu2 %v1768_v38  ;;  %2750 = vmatmul.msk.bf16.gmra.mxu3 %vm496_vm0, %v2894_v5 }
 0x32e   :  { %v1457_v49 = vpop.f32.mrf.mxu1 }
 0x32f   :  { %v1188_v41 = vpack.c.bf16 %v1103_v35, %v1102_v44  ;;  %v1458_v55 = vadd.f32 %v3477_v59, %v1457_v49 }
 0x330   :  { %v3598_v19 = vpop.f32.mrf.mxu2 }
 0x331   :  { %4235 = vst [vmem:[#allocation17_spill] sm:$0xff] %v3598_v19  ;;  %1496 = vmatmul.bf16.gmra.mxu1 %v1188_v41  ;;  %v1675_v24 = vmax.f32 %v1458_v55, 0.0  ;;  %v2889_v55 = vld [vmem:[%s4215_s1 + $0x1a0] sm:$0xff] }
 0x332   :  { %v913_v26 = vpop.f32.mrf.mxu0 }
 0x333   :  { %v914_v41 = vadd.f32 %v3405_v57, %v913_v26 }
 0x335   :  { %2744 = vmatmul.msk.bf16.gmra.mxu0 %vm496_vm0, %v2888_v47  ;;  %v1104_v49 = vmax.f32 %v914_v41, 0.0  ;;  %v2895_v41 = vld [vmem:[%s4215_s1 + $0x1d0] sm:$0xff] }
 0x336   :  { %v1459_v61 = vpop.f32.mrf.mxu1 }
 0x337   :  { %v1460_v8 = vadd.f32 %v3477_v59, %v1459_v61 }
 0x338   :  { %v3609_v14 = vpop.f32.mrf.mxu2 }
 0x339   :  { %4236 = vst [vmem:[#allocation18_spill] sm:$0xff] %v3609_v14  ;;  %v1676_v32 = vmax.f32 %v1460_v8, 0.0 }
 0x33a   :  { %v915_v38 = vpop.f32.mrf.mxu0 }
 0x33b   :  { %v916_v44 = vadd.f32 %v3405_v57, %v915_v38  ;;  %v1769_v35 = vpack.c.bf16 %v1676_v32, %v1675_v24 }
 0x33d   :  { %v1105_v47 = vmax.f32 %v916_v44, 0.0  ;;  %2045 = vmatmul.bf16.gmra.mxu2 %v1769_v35  ;;  %2751 = vmatmul.msk.bf16.gmra.mxu3 %vm496_vm0, %v2895_v41  ;;  %v2896_v41 = vld [vmem:[%s4215_s1 + $0x1d8] sm:$0xff] }
 0x33e   :  { %v1462_v61 = vpop.f32.mrf.mxu1 }
 0x33f   :  { %v1189_v4 = vpack.c.bf16 %v1105_v47, %v1104_v49  ;;  %v1463_v8 = vadd.f32 %v3477_v59, %v1462_v61 }
 0x340   :  { %v3614_v19 = vpop.f32.mrf.mxu2 }
 0x341   :  { %4237 = vst [vmem:[#allocation19_spill] sm:$0xff] %v3614_v19  ;;  %1501 = vmatmul.bf16.gmra.mxu1 %v1189_v4  ;;  %v1677_v32 = vmax.f32 %v1463_v8, 0.0 }
 0x342   :  { %v918_v26 = vpop.f32.mrf.mxu0 }
 0x343   :  { %v919_v38 = vadd.f32 %v3405_v57, %v918_v26 }
 0x345   :  { %2745 = vmatmul.msk.bf16.gmra.mxu0 %vm496_vm0, %v2889_v55  ;;  %v1106_v61 = vmax.f32 %v919_v38, 0.0 }
 0x346   :  { %v1464_v5 = vpop.f32.mrf.mxu1 }
 0x347   :  { %v1465_v24 = vadd.f32 %v3477_v59, %v1464_v5 }
 0x348   :  { %v3626_v44 = vpop.f32.mrf.mxu2 }
 0x349   :  { %v1678_v4 = vmax.f32 %v1465_v24, 0.0  ;;  %4238 = vst [vmem:[#allocation20_spill] sm:$0xff] %v3626_v44 }
 0x34a   :  { %v920_v35 = vpop.f32.mrf.mxu0 }
 0x34b   :  { %v921_v49 = vadd.f32 %v3405_v57, %v920_v35  ;;  %v1770_v47 = vpack.c.bf16 %v1678_v4, %v1677_v32 }
 0x34d   :  { %v1107_v55 = vmax.f32 %v921_v49, 0.0  ;;  %2050 = vmatmul.bf16.gmra.mxu2 %v1770_v47  ;;  %2752 = vmatmul.msk.bf16.gmra.mxu3 %vm496_vm0, %v2896_v41  ;;  %v2897_v41 = vld [vmem:[%s4215_s1 + $0x1e0] sm:$0xff] }
 0x34e   :  { %v1467_v5 = vpop.f32.mrf.mxu1 }
 0x34f   :  { %v1190_v14 = vpack.c.bf16 %v1107_v55, %v1106_v61  ;;  %v1468_v26 = vadd.f32 %v3477_v59, %v1467_v5 }
 0x350   :  { %v3630_v13 = vpop.f32.mrf.mxu2 }
 0x351   :  { %1506 = vmatmul.bf16.gmra.mxu1 %v1190_v14  ;;  %4239 = vst [vmem:[#allocation21_spill] sm:$0xff] %v3630_v13  ;;  %v1679_v35 = vmax.f32 %v1468_v26, 0.0 }
 0x352   :  { %v923_v19 = vpop.f32.mrf.mxu0 }
 0x353   :  { %v924_v32 = vadd.f32 %v3405_v57, %v923_v19 }
 0x355   :  { %v1108_v47 = vmax.f32 %v924_v32, 0.0 }
 0x356   :  { %v1469_v8 = vpop.f32.mrf.mxu1 }
 0x357   :  { %v1470_v24 = vadd.f32 %v3477_v59, %v1469_v8 }
 0x358   :  { %v3640_v61 = vpop.f32.mrf.mxu2 }
 0x359   :  { %v1680_v38 = vmax.f32 %v1470_v24, 0.0  ;;  %4240 = vst [vmem:[#allocation22_spill] sm:$0xff] %v3640_v61 }
 0x35a   :  { %v925_v4 = vpop.f32.mrf.mxu0 }
 0x35b   :  { %v926_v14 = vadd.f32 %v3405_v57, %v925_v4  ;;  %v1771_v49 = vpack.c.bf16 %v1680_v38, %v1679_v35 }
 0x35d   :  { %v1109_v55 = vmax.f32 %v926_v14, 0.0  ;;  %2055 = vmatmul.bf16.gmra.mxu2 %v1771_v49  ;;  %2753 = vmatmul.msk.bf16.gmra.mxu3 %vm496_vm0, %v2897_v41 }
 0x35e   :  { %v1472_v5 = vpop.f32.mrf.mxu1 }
 0x35f   :  { %v1191_v8 = vpack.c.bf16 %v1109_v55, %v1108_v47  ;;  %v1473_v26 = vadd.f32 %v3477_v59, %v1472_v5 }
 0x360   :  { %v3643_v19 = vpop.f32.mrf.mxu2 }
 0x361   :  { %1511 = vmatmul.bf16.gmra.mxu1 %v1191_v8  ;;  %4241 = vst [vmem:[#allocation23_spill] sm:$0xff] %v3643_v19  ;;  %v1681_v35 = vmax.f32 %v1473_v26, 0.0 }
 0x362   :  { %v928_v44 = vpop.f32.mrf.mxu0 }
 0x363   :  { %v929_v32 = vadd.f32 %v3405_v57, %v928_v44 }
 0x365   :  { %v1110_v47 = vmax.f32 %v929_v32, 0.0 }
 0x366   :  { %v1474_v13 = vpop.f32.mrf.mxu1 }
 0x367   :  { %v1475_v24 = vadd.f32 %v3477_v59, %v1474_v13 }
 0x368   :  { %v3652_v13 = vpop.f32.mrf.mxu2 }
 0x369   :  { %v1682_v38 = vmax.f32 %v1475_v24, 0.0  ;;  %4242 = vst [vmem:[#allocation24_spill] sm:$0xff] %v3652_v13  ;;  %v2898_v24 = vld [vmem:[%s4215_s1 + $0x1e8] sm:$0xff] }
 0x36a   :  { %v930_v4 = vpop.f32.mrf.mxu0 }
 0x36b   :  { %v931_v14 = vadd.f32 %v3405_v57, %v930_v4  ;;  %v1772_v49 = vpack.c.bf16 %v1682_v38, %v1681_v35 }
 0x36d   :  { %v1111_v55 = vmax.f32 %v931_v14, 0.0  ;;  %2060 = vmatmul.bf16.gmra.mxu2 %v1772_v49  ;;  %2754 = vmatmul.msk.bf16.gmra.mxu3 %vm496_vm0, %v2898_v24 }
 0x36e   :  { %v1477_v5 = vpop.f32.mrf.mxu1 }
 0x36f   :  { %v1192_v8 = vpack.c.bf16 %v1111_v55, %v1110_v47  ;;  %v1478_v26 = vadd.f32 %v3477_v59, %v1477_v5  ;;  %v3664_v47 = vpop.f32.mrf.mxu3 }
 0x370   :  { %v3661_v4 = vpop.f32.mrf.mxu2 }
 0x371   :  { %1516 = vmatmul.bf16.gmra.mxu1 %v1192_v8  ;;  %v1683_v41 = vmax.f32 %v1478_v26, 0.0  ;;  %4243 = vst [vmem:[#allocation25_spill] sm:$0xff] %v3661_v4 }
 0x372   :  { %v933_v61 = vpop.f32.mrf.mxu0 }
 0x373   :  { %v934_v35 = vadd.f32 %v3405_v57, %v933_v61 }
 0x375   :  { %v1112_v55 = vmax.f32 %v934_v35, 0.0 }
 0x376   :  { %v1479_v19 = vpop.f32.mrf.mxu1 }
 0x377   :  { %v1480_v44 = vadd.f32 %v3477_v59, %v1479_v19  ;;  %v3666_v13 = vpop.f32.mrf.mxu3 }
 0x378   :  { %v3668_v61 = vpop.f32.mrf.mxu2 }
 0x379   :  { %v1684_v32 = vmax.f32 %v1480_v44, 0.0  ;;  %4244 = vst [vmem:[#allocation26_spill] sm:$0xff] %v3668_v61 }
 0x37a   :  { %v935_v38 = vpop.f32.mrf.mxu0 }
 0x37b   :  { %v936_v14 = vadd.f32 %v3405_v57, %v935_v38  ;;  %v1773_v49 = vpack.c.bf16 %v1684_v32, %v1683_v41  ;;  %v2899_v41 = vld [vmem:[%s4215_s1 + $0x1f0] sm:$0xff] }
 0x37d   :  { %v1113_v19 = vmax.f32 %v936_v14, 0.0  ;;  %2065 = vmatmul.bf16.gmra.mxu2 %v1773_v49  ;;  %2755 = vmatmul.msk.bf16.gmra.mxu3 %vm496_vm0, %v2899_v41 }
 0x37e   :  { %v1482_v5 = vpop.f32.mrf.mxu1 }
 0x37f   :  { %v1193_v8 = vpack.c.bf16 %v1113_v19, %v1112_v55  ;;  %v1483_v44 = vadd.f32 %v3477_v59, %v1482_v5 }
 0x380   :  { %v3678_v61 = vpop.f32.mrf.mxu3 }
 0x381   :  { %1521 = vmatmul.bf16.gmra.mxu1 %v1193_v8  ;;  %v1685_v35 = vmax.f32 %v1483_v44, 0.0 }
 0x382   :  { %v938_v26 = vpop.f32.mrf.mxu0 }
 0x383   :  { %v939_v32 = vadd.f32 %v3405_v57, %v938_v26 }
 0x385   :  { %v1114_v19 = vmax.f32 %v939_v32, 0.0 }
 0x386   :  { %v1484_v24 = vpop.f32.mrf.mxu1 }
 0x387   :  { %v1485_v4 = vadd.f32 %v3477_v59, %v1484_v24  ;;  %v3680_v24 = vpop.f32.mrf.mxu2 }
 0x388   :  { %4245 = vst [vmem:[#allocation27_spill] sm:$0xff] %v3680_v24  ;;  %v3687_v32 = vpop.f32.mrf.mxu3 }
 0x389   :  { %v1686_v38 = vmax.f32 %v1485_v4, 0.0 }
 0x38a   :  { %v940_v14 = vpop.f32.mrf.mxu0 }
 0x38b   :  { %v941_v49 = vadd.f32 %v3405_v57, %v940_v14  ;;  %v1774_v55 = vpack.c.bf16 %v1686_v38, %v1685_v35  ;;  %v2900_v35 = vld [vmem:[%s4215_s1 + $0x1f8] sm:$0xff] }
 0x38d   :  { %v1115_v8 = vmax.f32 %v941_v49, 0.0  ;;  %2070 = vmatmul.bf16.gmra.mxu2 %v1774_v55  ;;  %2756 = vmatmul.msk.bf16.gmra.mxu3 %vm496_vm0, %v2900_v35 }
 0x38e   :  { %v1487_v5 = vpop.f32.mrf.mxu1 }
 0x38f   :  { %v1194_v27 = vpack.c.bf16 %v1115_v8, %v1114_v19  ;;  %v1488_v26 = vadd.f32 %v3477_v59, %v1487_v5  ;;  %v3689_v38 = vpop.f32.mrf.mxu2 }
 0x390   :  { %4246 = vst [vmem:[#allocation28_spill] sm:$0xff] %v3689_v38  ;;  %v3694_v30 = vpop.f32.mrf.mxu3 }
 0x391   :  { %1526 = vmatmul.bf16.gmra.mxu1 %v1194_v27  ;;  %v1687_v14 = vmax.f32 %v1488_v26, 0.0 }
 0x392   :  { %v943_v44 = vpop.f32.mrf.mxu0 }
 0x393   :  { %v944_v49 = vadd.f32 %v3405_v57, %v943_v44 }
 0x395   :  { %v1116_v5 = vmax.f32 %v944_v49, 0.0 }
 0x396   :  { %v1489_v4 = vpop.f32.mrf.mxu1 }
 0x397   :  { %v1490_v41 = vadd.f32 %v3477_v59, %v1489_v4  ;;  %v3696_v38 = vpop.f32.mrf.mxu2 }
 0x398   :  { %4247 = vst [vmem:[#allocation29_spill] sm:$0xff] %v3696_v38 }
 0x399   :  { %v1688_v55 = vmax.f32 %v1490_v41, 0.0 }
 0x39a   :  { %v945_v27 = vpop.f32.mrf.mxu0 }
 0x39b   :  { %v1775_v19 = vpack.c.bf16 %v1688_v55, %v1687_v14  ;;  %v946_v8 = vadd.f32 %v3405_v57, %v945_v27 }
 0x39d   :  { %v1117_v4 = vmax.f32 %v946_v8, 0.0  ;;  %2075 = vmatmul.bf16.gmra.mxu2 %v1775_v19  ;;  %v3702_v8 = vpop.f32.mrf.mxu3 }
 0x39e   :  { %v1492_v24 = vpop.f32.mrf.mxu1 }
 0x39f   :  { %v1195_v51 = vpack.c.bf16 %v1117_v4, %v1116_v5  ;;  %v1493_v44 = vadd.f32 %v3477_v59, %v1492_v24 }
 0x3a1   :  { %1531 = vmatmul.bf16.gmra.mxu1 %v1195_v51  ;;  %v1689_v35 = vmax.f32 %v1493_v44, 0.0  ;;  %v3704_v51 = vpop.f32.mrf.mxu2 }
 0x3a2   :  { %v948_v2 = vpop.f32.mrf.mxu0  ;;  %4248 = vst [vmem:[#allocation30_spill] sm:$0xff] %v3704_v51 }
 0x3a3   :  { %v949_v14 = vadd.f32 %v3405_v57, %v948_v2 }
 0x3a5   :  { %v1118_v5 = vmax.f32 %v949_v14, 0.0  ;;  %v3707_v2 = vpop.f32.mrf.mxu3 }
 0x3a6   :  { %v1494_v26 = vpop.f32.mrf.mxu1 }
 0x3a7   :  { %v1495_v41 = vadd.f32 %v3477_v59, %v1494_v26 }
 0x3a9   :  { %v1690_v55 = vmax.f32 %v1495_v41, 0.0  ;;  %v3709_v41 = vpop.f32.mrf.mxu2 }
 0x3aa   :  { %v950_v49 = vpop.f32.mrf.mxu0  ;;  %4249 = vst [vmem:[#allocation31_spill] sm:$0xff] %v3709_v41 }
 0x3ab   :  { %v1776_v27 = vpack.c.bf16 %v1690_v55, %v1689_v35  ;;  %v951_v19 = vadd.f32 %v3405_v57, %v950_v49 }
 0x3ad   :  { %v1119_v4 = vmax.f32 %v951_v19, 0.0  ;;  %2080 = vmatmul.bf16.gmra.mxu2 %v1776_v27  ;;  %v3714_v12 = vpop.f32.mrf.mxu3 }
 0x3ae   :  { %v1497_v38 = vpop.f32.mrf.mxu1 }
 0x3af   :  { %v1196_v24 = vpack.c.bf16 %v1119_v4, %v1118_v5  ;;  %v1498_v44 = vadd.f32 %v3477_v59, %v1497_v38 }
 0x3b1   :  { %1536 = vmatmul.bf16.gmra.mxu1 %v1196_v24  ;;  %v1691_v55 = vmax.f32 %v1498_v44, 0.0  ;;  %v3716_v29 = vpop.f32.mrf.mxu2 }
 0x3b2   :  { %v953_v45 = vpop.f32.mrf.mxu0 }
 0x3b3   :  { %v954_v49 = vadd.f32 %v3405_v57, %v953_v45 }
 0x3b5   :  { %v1120_v5 = vmax.f32 %v954_v49, 0.0 }
 0x3b6   :  { %v1499_v26 = vpop.f32.mrf.mxu1 }
 0x3b7   :  { %v1500_v35 = vadd.f32 %v3477_v59, %v1499_v26 }
 0x3b9   :  { %v1692_v51 = vmax.f32 %v1500_v35, 0.0 }
 0x3ba   :  { %v955_v14 = vpop.f32.mrf.mxu0 }
 0x3bb   :  { %v1777_v19 = vpack.c.bf16 %v1692_v51, %v1691_v55  ;;  %v956_v27 = vadd.f32 %v3405_v57, %v955_v14  ;;  %v3721_v14 = vpop.f32.mrf.mxu3 }
 0x3bd   :  { %v1121_v4 = vmax.f32 %v956_v27, 0.0  ;;  %2085 = vmatmul.bf16.gmra.mxu2 %v1777_v19  ;;  %v3723_v19 = vpop.f32.mrf.mxu2 }
 0x3be   :  { %v1502_v24 = vpop.f32.mrf.mxu1 }
 0x3bf   :  { %v1197_v38 = vpack.c.bf16 %v1121_v4, %v1120_v5  ;;  %v1503_v44 = vadd.f32 %v3477_v59, %v1502_v24  ;;  %v3729_v24 = vld [vmem:[%s4221_s7] ss:$0 sm:$0xff] }
 0x3c1   :  { %1541 = vmatmul.bf16.gmra.mxu1 %v1197_v38  ;;  %v1693_v35 = vmax.f32 %v1503_v44, 0.0 }
 0x3c2   :  { %v958_v41 = vpop.f32.mrf.mxu0 }
 0x3c3   :  { %v959_v51 = vadd.f32 %v3405_v57, %v958_v41  ;;  %v1914_v41 = vadd.f32 %v3729_v24, %v3340_v60 }
 0x3c5   :  { %v1122_v4 = vmax.f32 %v959_v51, 0.0  ;;  %v3737_v51 = vpop.f32.mrf.mxu3 }
 0x3c6   :  { %v1504_v26 = vpop.f32.mrf.mxu1 }
 0x3c7   :  { %v1505_v45 = vadd.f32 %v3477_v59, %v1504_v26 }
 0x3c9   :  { %v1694_v55 = vmax.f32 %v1505_v45, 0.0  ;;  %v1912_v45 = vadd.f32 %v3729_v24, %v3332_v52  ;;  %v966_v52 = vadd.f32 %v3405_v57, %v3666_v13 }
 0x3ca   :  { %v960_v49 = vpop.f32.mrf.mxu0 }
 0x3cb   :  { %v1778_v27 = vpack.c.bf16 %v1694_v55, %v1693_v35  ;;  %v961_v5 = vadd.f32 %v3405_v57, %v960_v49  ;;  %v1909_v35 = vadd.f32 %v3729_v24, %v3328_v39  ;;  %v3739_v55 = vpop.f32.mrf.mxu2 }
 0x3cd   :  { %v1123_v38 = vmax.f32 %v961_v5, 0.0  ;;  %2090 = vmatmul.bf16.gmra.mxu2 %v1778_v27  ;;  %v1907_v27 = vadd.f32 %v3729_v24, %v3320_v31  ;;  %v964_v5 = vadd.f32 %v3405_v57, %v3664_v47  ;;  %v1899_v47 = vadd.f32 %v3729_v24, %v3304_v62  ;;  %v3757_v13 = vpop.f32.mrf.mxu3 }
 0x3ce   :  { %v1507_v44 = vpop.f32.mrf.mxu1  ;;  %v1897_v57 = vadd.f32 %v3729_v24, %v3296_v56  ;;  %v1892_v62 = vadd.f32 %v3729_v24, %v3284_v37 }
 0x3cf   :  { %v1198_v26 = vpack.c.bf16 %v1123_v38, %v1122_v4  ;;  %v1508_v49 = vadd.f32 %v3477_v59, %v1507_v44  ;;  %v1904_v4 = vadd.f32 %v3729_v24, %v3316_v17  ;;  %v1902_v44 = vadd.f32 %v3729_v24, %v3308_v11 }
 0x3d0   :  { %v1124_v31 = vmax.f32 %v964_v5, 0.0  ;;  %v1894_v11 = vadd.f32 %v3729_v24, %v3292_v43  ;;  %v3773_v43 = vld [vmem:[%s4217_s3] ss:$0 sm:$0xff] }
 0x3d1   :  { %1546 = vmatmul.bf16.vlgmr.msrb.gmra.mxu3 %v1198_v26  ;;  %v1695_v38 = vmax.f32 %v1508_v49, 0.0  ;;  %v969_v37 = vadd.f32 %v3773_v43, %v3678_v61 }
 0x3d2   :  { %2232 = vmatpush.msrb.mxu3 %v1914_v41  ;;  %v1125_v41 = vmax.f32 %v966_v52, 0.0  ;;  %v971_v52 = vadd.f32 %v3773_v43, %v3687_v32  ;;  %v1879_v32 = vadd.f32 %v3729_v24, %v3256_v54  ;;  %v974_v54 = vadd.f32 %v3773_v43, %v3694_v30 }
 0x3d3   :  { %v1126_v61 = vmax.f32 %v969_v37, 0.0 }
 0x3d4   :  { %2233 = vmatpush.msrb.mxu3 %v1912_v45  ;;  %v1199_v49 = vpack.c.bf16 %v1125_v41, %v1124_v31  ;;  %v1127_v31 = vmax.f32 %v971_v52, 0.0 }
 0x3d6   :  { %2234 = vmatpush.msrb.mxu3 %v1909_v35  ;;  %v1509_v60 = vpop.f32.mrf.mxu1  ;;  %v3759_v35 = vpop.f32.mrf.mxu2 }
 0x3d7   :  { %v1510_v39 = vadd.f32 %v3477_v59, %v1509_v60  ;;  %v1887_v60 = vadd.f32 %v3729_v24, %v3272_v18  ;;  %v3782_v18 = vpop.f32.mrf.mxu3 }
 0x3d8   :  { %2235 = vmatpush.msrb.mxu3 %v1907_v27  ;;  %v1889_v27 = vadd.f32 %v3729_v24, %v3280_v25 }
 0x3d9   :  { %v1696_v26 = vmax.f32 %v1510_v39, 0.0  ;;  %v1884_v39 = vadd.f32 %v3729_v24, %v3268_v7  ;;  %v1877_v7 = vadd.f32 %v3729_v24, %v3248_v48 }
 0x3da   :  { %2236 = vmatpush.msrb.mxu3 %v1904_v4 }
 0x3db   :  { %v1779_v45 = vpack.c.bf16 %v1696_v26, %v1695_v38 }
 0x3dc   :  { %2237 = vmatpush.msrb.mxu3 %v1902_v44  ;;  %v1882_v44 = vadd.f32 %v3729_v24, %v3260_v1 }
 0x3dd   :  { %2095 = vmatmul.bf16.gmra.mxu2 %v1779_v45 }
 0x3de   :  { %2238 = vmatpush.msrb.mxu3 %v1899_v47  ;;  %v1512_v17 = vpop.f32.mrf.mxu1  ;;  %v3784_v4 = vpop.f32.mrf.mxu2  ;;  %v1200_v47 = vpack.c.bf16 %v1127_v31, %v1126_v61 }
 0x3df   :  { %v1513_v56 = vadd.f32 %v3477_v59, %v1512_v17 }
 0x3e0   :  { %2239 = vmatpush.msrb.mxu3 %v1897_v57  ;;  %v3792_v57 = vpop.f32.mrf.mxu3 }
 0x3e1   :  { %1551 = vmatmul.bf16.gmra.mxu3 %v1199_v49  ;;  %v1697_v38 = vmax.f32 %v1513_v56, 0.0  ;;  %v1128_v56 = vmax.f32 %v974_v54, 0.0 }
 0x3e2   :  { %2240 = vmatpush.msrb.mxu3 %v1894_v11  ;;  %v976_v11 = vadd.f32 %v3773_v43, %v3702_v8  ;;  %v979_v8 = vadd.f32 %v3773_v43, %v3707_v2 }
 0x3e4   :  { %2241 = vmatpush.msrb.mxu3 %v1892_v62 }
 0x3e6   :  { %2242 = vmatpush.msrb.mxu3 %v1889_v27  ;;  %v1514_v5 = vpop.f32.mrf.mxu1  ;;  %v3794_v1 = vpop.f32.mrf.mxu2 }
 0x3e7   :  { %v1515_v25 = vadd.f32 %v3477_v59, %v1514_v5 }
 0x3e8   :  { %2243 = vmatpush.msrb.mxu3 %v1887_v60  ;;  %v1129_v60 = vmax.f32 %v976_v11, 0.0  ;;  %v995_v37 = vpop.f32.mrf.mxu3 }
 0x3e9   :  { %v1698_v26 = vmax.f32 %v1515_v25, 0.0 }
 0x3ea   :  { %2244 = vmatpush.msrb.mxu3 %v1884_v39  ;;  %v1201_v39 = vpack.c.bf16 %v1129_v60, %v1128_v56 }
 0x3eb   :  { %v1780_v41 = vpack.c.bf16 %v1698_v26, %v1697_v38 }
 0x3ec   :  { %2245 = vmatpush.msrb.mxu3 %v1882_v44  ;;  %v981_v44 = vadd.f32 %v3773_v43, %v3714_v12  ;;  %v984_v12 = vadd.f32 %v3773_v43, %v3721_v14 }
 0x3ed   :  { %2100 = vmatmul.bf16.gmra.mxu2 %v1780_v41 }
 0x3ee   :  { %2246 = vmatpush.msrb.mxu3 %v1879_v32  ;;  %v1517_v45 = vpop.f32.mrf.mxu1  ;;  %v3802_v52 = vpop.f32.mrf.mxu2 }
 0x3ef   :  { %v1518_v17 = vadd.f32 %v3477_v59, %v1517_v45  ;;  %v1131_v45 = vmax.f32 %v981_v44, 0.0 }
 0x3f0   :  { %2247 = vmatpush.msrb.mxu3 %v1877_v7  ;;  %v3805_v26 = vpop.f32.mrf.mxu3  ;;  %v1130_v7 = vmax.f32 %v979_v8, 0.0 }
 0x3f1   :  { %1556 = vmatmul.bf16.gmra.mxu3 %v1200_v47  ;;  %v1699_v62 = vmax.f32 %v1518_v17, 0.0 }
 0x3f6   :  { %v1519_v49 = vpop.f32.mrf.mxu1  ;;  %v3811_v61 = vpop.f32.mrf.mxu2 }
 0x3f7   :  { %v1520_v48 = vadd.f32 %v3477_v59, %v1519_v49  ;;  %v1202_v49 = vpack.c.bf16 %v1131_v45, %v1130_v7  ;;  %v991_v7 = vadd.f32 %v3773_v43, %v3782_v18  ;;  %v994_v18 = vadd.f32 %v3773_v43, %v3792_v57  ;;  %v3846_v57 = vld [vmem:[%s4219_s5] ss:$0 sm:$0xff] }
 0x3f8   :  { %v1000_v54 = vpop.f32.mrf.mxu3 }
 0x3f9   :  { %v1700_v27 = vmax.f32 %v1520_v48, 0.0 }
 0x3fb   :  { %v1781_v5 = vpack.c.bf16 %v1700_v27, %v1699_v62  ;;  %v986_v62 = vadd.f32 %v3773_v43, %v3737_v51 }
 0x3fd   :  { %2105 = vmatmul.bf16.gmra.mxu2 %v1781_v5 }
 0x3fe   :  { %v1522_v25 = vpop.f32.mrf.mxu1  ;;  %v3814_v11 = vpop.f32.mrf.mxu2 }
 0x3ff   :  { %v1523_v38 = vadd.f32 %v3477_v59, %v1522_v25  ;;  %v1132_v25 = vmax.f32 %v984_v12, 0.0 }
 0x400   :  { %v1003_v5 = vpop.f32.mrf.mxu3 }
 0x401   :  { %1561 = vmatmul.bf16.gmra.mxu3 %v1201_v39  ;;  %v1701_v41 = vmax.f32 %v1523_v38, 0.0  ;;  %v1133_v39 = vmax.f32 %v986_v62, 0.0 }
 0x403   :  { %v1203_v44 = vpack.c.bf16 %v1133_v39, %v1132_v25  ;;  %v996_v25 = vadd.f32 %v3773_v43, %v995_v37 }
 0x406   :  { %v1524_v30 = vpop.f32.mrf.mxu1  ;;  %v3822_v38 = vpop.f32.mrf.mxu2 }
 0x407   :  { %v1525_v31 = vadd.f32 %v3477_v59, %v1524_v30 }
 0x409   :  { %v1702_v32 = vmax.f32 %v1525_v31, 0.0  ;;  %v1005_v31 = vpop.f32.mrf.mxu3 }
 0x40b   :  { %v1782_v47 = vpack.c.bf16 %v1702_v32, %v1701_v41  ;;  %v989_v32 = vadd.f32 %v3773_v43, %v3757_v13 }
 0x40d   :  { %2110 = vmatmul.bf16.gmra.mxu2 %v1782_v47 }
 0x40e   :  { %v1527_v17 = vpop.f32.mrf.mxu1  ;;  %v3824_v41 = vpop.f32.mrf.mxu2 }
 0x40f   :  { %v1528_v2 = vadd.f32 %v3477_v59, %v1527_v17 }
 0x411   :  { %1566 = vmatmul.bf16.gmra.mxu3 %v1202_v49  ;;  %v1703_v56 = vmax.f32 %v1528_v2, 0.0  ;;  %v1134_v49 = vmax.f32 %v989_v32, 0.0  ;;  %v1135_v2 = vmax.f32 %v991_v7, 0.0  ;;  %v1008_v12 = vpop.f32.mrf.mxu3  ;;  %v1137_v32 = vmax.f32 %v996_v25, 0.0 }
 0x416   :  { %v1529_v48 = vpop.f32.mrf.mxu1 }
 0x417   :  { %v1530_v27 = vadd.f32 %v3477_v59, %v1529_v48 }
 0x419   :  { %v1704_v60 = vmax.f32 %v1530_v27, 0.0  ;;  %v3832_v27 = vpop.f32.mrf.mxu2 }
 0x41b   :  { %v1783_v30 = vpack.c.bf16 %v1704_v60, %v1703_v56  ;;  %v1204_v56 = vpack.c.bf16 %v1135_v2, %v1134_v49  ;;  %v999_v2 = vadd.f32 %v3773_v43, %v3805_v26  ;;  %v1006_v26 = vadd.f32 %v3773_v43, %v1005_v31 }
 0x41d   :  { %2115 = vmatmul.bf16.gmra.mxu2 %v1783_v30  ;;  %v1010_v30 = vpop.f32.mrf.mxu3 }
 0x41e   :  { %v1532_v8 = vpop.f32.mrf.mxu1 }
 0x41f   :  { %v1533_v14 = vadd.f32 %v3477_v59, %v1532_v8 }
 0x421   :  { %1571 = vmatmul.bf16.gmra.mxu3 %v1203_v44  ;;  %v1705_v47 = vmax.f32 %v1533_v14, 0.0  ;;  %v3839_v8 = vpop.f32.mrf.mxu2 }
 0x426   :  { %v1534_v51 = vpop.f32.mrf.mxu1 }
 0x427   :  { %v1535_v45 = vadd.f32 %v3477_v59, %v1534_v51  ;;  %v1136_v51 = vmax.f32 %v994_v18, 0.0 }
 0x429   :  { %v1706_v17 = vmax.f32 %v1535_v45, 0.0  ;;  %v3841_v49 = vpop.f32.mrf.mxu2 }
 0x42b   :  { %v1784_v48 = vpack.c.bf16 %v1706_v17, %v1705_v47  ;;  %v1205_v47 = vpack.c.bf16 %v1137_v32, %v1136_v51  ;;  %v1013_v17 = vpop.f32.mrf.mxu3  ;;  %v1004_v32 = vadd.f32 %v3773_v43, %v1003_v5 }
 0x42c   :  { %v1014_v5 = vadd.f32 %v3773_v43, %v1013_v17  ;;  %v1949_v17 = vadd.f32 %v3729_v24, %v3429_v50  ;;  %v1939_v50 = vadd.f32 %v3729_v24, %v3400_v53  ;;  %v1929_v53 = vadd.f32 %v3729_v24, %v3376_v3 }
 0x42d   :  { %2120 = vmatmul.bf16.gmra.mxu2 %v1784_v48  ;;  %v1001_v48 = vadd.f32 %v3773_v43, %v1000_v54  ;;  %v1141_v54 = vmax.f32 %v1006_v26, 0.0  ;;  %v1919_v3 = vadd.f32 %v3729_v24, %v3352_v20 }
 0x42e   :  { %v1537_v62 = vpop.f32.mrf.mxu1 }
 0x42f   :  { %v1538_v60 = vadd.f32 %v3477_v59, %v1537_v62  ;;  %v1139_v18 = vmax.f32 %v1001_v48, 0.0 }
 0x431   :  { %1576 = vmatmul.bf16.gmra.mxu3 %v1204_v56  ;;  %v1707_v44 = vmax.f32 %v1538_v60, 0.0 }
 0x436   :  { %v1539_v13 = vpop.f32.mrf.mxu1 }
 0x437   :  { %v1540_v39 = vadd.f32 %v3477_v59, %v1539_v13  ;;  %v1138_v13 = vmax.f32 %v999_v2, 0.0  ;;  %v1011_v2 = vadd.f32 %v3773_v43, %v1010_v30 }
 0x439   :  { %v1708_v14 = vmax.f32 %v1540_v39, 0.0  ;;  %v1015_v39 = vpop.f32.mrf.mxu3 }
 0x43a   :  { %v1016_v31 = vadd.f32 %v3773_v43, %v1015_v39 }
 0x43b   :  { %v1785_v7 = vpack.c.bf16 %v1708_v14, %v1707_v44  ;;  %v3853_v44 = vpop.f32.mrf.mxu2  ;;  %v1206_v14 = vpack.c.bf16 %v1139_v18, %v1138_v13  ;;  %v1144_v18 = vmax.f32 %v1014_v5, 0.0 }
 0x43d   :  { %2125 = vmatmul.bf16.gmra.mxu2 %v1785_v7  ;;  %v1140_v7 = vmax.f32 %v1004_v32, 0.0 }
 0x43e   :  { %v1542_v45 = vpop.f32.mrf.mxu1 }
 0x43f   :  { %v1543_v59 = vadd.f32 %v3846_v57, %v1542_v45 }
 0x441   :  { %1581 = vmatmul.bf16.gmra.mxu3 %v1205_v47  ;;  %v1709_v56 = vmax.f32 %v1543_v59, 0.0  ;;  %v1207_v47 = vpack.c.bf16 %v1141_v54, %v1140_v7 }
 0x446   :  { %v1544_v37 = vpop.f32.mrf.mxu1 }
 0x447   :  { %v1545_v62 = vadd.f32 %v3846_v57, %v1544_v37  ;;  %v1009_v37 = vadd.f32 %v3773_v43, %v1008_v12  ;;  %v1952_v43 = vadd.f32 %v3729_v24, %v3433_v6  ;;  %v1942_v6 = vadd.f32 %v3729_v24, %v3409_v9 }
 0x448   :  { %v1932_v9 = vadd.f32 %v3729_v24, %v3380_v21  ;;  %v1922_v21 = vadd.f32 %v3729_v24, %v3356_v33 }
 0x449   :  { %v1710_v60 = vmax.f32 %v1545_v62, 0.0  ;;  %v1142_v48 = vmax.f32 %v1009_v37, 0.0  ;;  %v1143_v62 = vmax.f32 %v1011_v2, 0.0  ;;  %v1954_v2 = vadd.f32 %v3729_v24, %v3441_v16 }
 0x44b   :  { %v1786_v25 = vpack.c.bf16 %v1710_v60, %v1709_v56  ;;  %v1208_v60 = vpack.c.bf16 %v1143_v62, %v1142_v48  ;;  %v1944_v48 = vadd.f32 %v3729_v24, %v3417_v22  ;;  %v1934_v22 = vadd.f32 %v3729_v24, %v3388_v28 }
 0x44c   :  { %v1924_v28 = vadd.f32 %v3729_v24, %v3364_v42 }
 0x44d   :  { %2130 = vmatmul.bf16.gmra.mxu2 %v1786_v25  ;;  %v1145_v25 = vmax.f32 %v1016_v31, 0.0  ;;  %v1927_v31 = vadd.f32 %v3729_v24, %v3368_v58 }
 0x44f   :  { %v1209_v32 = vpack.c.bf16 %v1145_v25, %v1144_v18 }
 0x451   :  { %1586 = vmatmul.bf16.gmra.mxu3 %v1206_v14 }
 0x454   :  { %v1547_v51 = vpop.f32.mrf.mxu3 }
 0x455   :  { %v1548_v30 = vadd.f32 %v3846_v57, %v1547_v51  ;;  %v1947_v51 = vadd.f32 %v3729_v24, %v3421_v40 }
 0x45c   :  { %v1549_v45 = vpop.f32.mrf.mxu3 }
 0x45d   :  { %v1550_v12 = vadd.f32 %v3846_v57, %v1549_v45 }
 0x45f   :  { %v1712_v7 = vmax.f32 %v1550_v12, 0.0 }
 0x461   :  { %1591 = vmatmul.bf16.gmra.mxu3 %v1207_v47  ;;  %v1711_v47 = vmax.f32 %v1548_v30, 0.0 }
 0x463   :  { %v1787_v37 = vpack.c.bf16 %v1712_v7, %v1711_v47 }
 0x464   :  { %v1552_v59 = vpop.f32.mrf.mxu3 }
 0x465   :  { %v1553_v16 = vadd.f32 %v3846_v57, %v1552_v59 }
 0x467   :  { %v1713_v40 = vmax.f32 %v1553_v16, 0.0 }
 0x46c   :  { %v1554_v56 = vpop.f32.mrf.mxu3 }
 0x46d   :  { %v1555_v45 = vadd.f32 %v3846_v57, %v1554_v56  ;;  %v1937_v56 = vadd.f32 %v3729_v24, %v3392_v46 }
 0x46f   :  { %v1714_v62 = vmax.f32 %v1555_v45, 0.0 }
 0x471   :  { %1596 = vmatmul.bf16.gmra.mxu3 %v1208_v60  ;;  %v1788_v5 = vpack.c.bf16 %v1714_v62, %v1713_v40 }
 0x474   :  { %v1557_v13 = vpop.f32.mrf.mxu3 }
 0x475   :  { %v1558_v18 = vadd.f32 %v3846_v57, %v1557_v13 }
 0x477   :  { %v1715_v58 = vmax.f32 %v1558_v18, 0.0 }
 0x47c   :  { %v1559_v14 = vpop.f32.mrf.mxu3 }
 0x47d   :  { %v1560_v46 = vadd.f32 %v3846_v57, %v1559_v14  ;;  %v1917_v14 = vadd.f32 %v3729_v24, %v3344_v10 }
 0x47f   :  { %v1716_v25 = vmax.f32 %v1560_v46, 0.0 }
 0x481   :  { %1601 = vmatmul.bf16.gmra.mxu3 %v1209_v32  ;;  %v1789_v12 = vpack.c.bf16 %v1716_v25, %v1715_v58 }
 0x484   :  { %v1562_v26 = vpop.f32.mrf.mxu3 }
 0x485   :  { %v1563_v33 = vadd.f32 %v3846_v57, %v1562_v26 }
 0x487   :  { %v1717_v47 = vmax.f32 %v1563_v33, 0.0 }
 0x48c   :  { %v1564_v54 = vpop.f32.mrf.mxu3 }
 0x48d   :  { %v1565_v13 = vadd.f32 %v3846_v57, %v1564_v54 }
 0x48f   :  { %v1718_v30 = vmax.f32 %v1565_v13, 0.0 }
 0x491   :  { %2135 = vmatmul.bf16.vlgmr.msra.gmra.mxu3 %v1787_v37  ;;  %v1790_v37 = vpack.c.bf16 %v1718_v30, %v1717_v47 }
 0x492   :  { %2252 = vmatpush.msra.mxu3 %v1954_v2 }
 0x494   :  { %2253 = vmatpush.msra.mxu3 %v1952_v43  ;;  %v1567_v39 = vpop.f32.mrf.mxu3 }
 0x495   :  { %v1568_v43 = vadd.f32 %v3846_v57, %v1567_v39 }
 0x496   :  { %2254 = vmatpush.msra.mxu3 %v1949_v17 }
 0x498   :  { %2255 = vmatpush.msra.mxu3 %v1947_v51  ;;  %v1719_v51 = vmax.f32 %v1568_v43, 0.0 }
 0x49a   :  { %2256 = vmatpush.msra.mxu3 %v1944_v48 }
 0x49c   :  { %2257 = vmatpush.msra.mxu3 %v1942_v6  ;;  %v1569_v60 = vpop.f32.mrf.mxu3 }
 0x49d   :  { %v1570_v2 = vadd.f32 %v3846_v57, %v1569_v60 }
 0x49e   :  { %2258 = vmatpush.msra.mxu3 %v1939_v50 }
 0x49f   :  { %v1720_v10 = vmax.f32 %v1570_v2, 0.0 }
 0x4a0   :  { %2259 = vmatpush.msra.mxu3 %v1937_v56 }
 0x4a1   :  { %2140 = vmatmul.bf16.gmra.mxu3 %v1788_v5  ;;  %v1791_v45 = vpack.c.bf16 %v1720_v10, %v1719_v51 }
 0x4a2   :  { %2260 = vmatpush.msra.mxu3 %v1934_v22 }
 0x4a4   :  { %2261 = vmatpush.msra.mxu3 %v1932_v9  ;;  %v1572_v59 = vpop.f32.mrf.mxu3 }
 0x4a5   :  { %v1573_v26 = vadd.f32 %v3846_v57, %v1572_v59 }
 0x4a6   :  { %2262 = vmatpush.msra.mxu3 %v1929_v53 }
 0x4a7   :  { %v1721_v62 = vmax.f32 %v1573_v26, 0.0 }
 0x4a8   :  { %2263 = vmatpush.msra.mxu3 %v1927_v31  ;;  %v3907_v31 = vpop.f32.mrf.mxu2 }
 0x4aa   :  { %2264 = vmatpush.msra.mxu3 %v1924_v28 }
 0x4ac   :  { %2265 = vmatpush.msra.mxu3 %v1922_v21  ;;  %v1574_v32 = vpop.f32.mrf.mxu3 }
 0x4ad   :  { %v1575_v54 = vadd.f32 %v3846_v57, %v1574_v32 }
 0x4ae   :  { %2266 = vmatpush.msra.mxu3 %v1919_v3 }
 0x4af   :  { %v1722_v16 = vmax.f32 %v1575_v54, 0.0 }
 0x4b0   :  { %2267 = vmatpush.msra.mxu3 %v1917_v14  ;;  %v3911_v3 = vpop.f32.mrf.mxu2 }
 0x4b1   :  { %2145 = vmatmul.bf16.gmra.mxu3 %v1789_v12  ;;  %v1792_v50 = vpack.c.bf16 %v1722_v16, %v1721_v62 }
 0x4b4   :  { %v1577_v42 = vpop.f32.mrf.mxu3 }
 0x4b5   :  { %v1578_v39 = vadd.f32 %v3846_v57, %v1577_v42 }
 0x4b7   :  { %v1723_v22 = vmax.f32 %v1578_v39, 0.0 }
 0x4b8   :  { %v3915_v12 = vpop.f32.mrf.mxu2 }
 0x4bc   :  { %v1579_v7 = vpop.f32.mrf.mxu3 }
 0x4bd   :  { %v1580_v60 = vadd.f32 %v3846_v57, %v1579_v7 }
 0x4bf   :  { %v1724_v56 = vmax.f32 %v1580_v60, 0.0 }
 0x4c0   :  { %v3919_v47 = vpop.f32.mrf.mxu2 }
 0x4c1   :  { %2150 = vmatmul.bf16.gmra.mxu3 %v1790_v37  ;;  %v1793_v9 = vpack.c.bf16 %v1724_v56, %v1723_v22 }
 0x4c4   :  { %v1582_v20 = vpop.f32.mrf.mxu3 }
 0x4c5   :  { %v1583_v46 = vadd.f32 %v3846_v57, %v1582_v20 }
 0x4c7   :  { %v1725_v21 = vmax.f32 %v1583_v46, 0.0 }
 0x4cc   :  { %v1584_v17 = vpop.f32.mrf.mxu3 }
 0x4cd   :  { %v1585_v59 = vadd.f32 %v3846_v57, %v1584_v17  ;;  %v3925_v17 = vpop.f32.mrf.mxu2 }
 0x4cf   :  { %v1726_v28 = vmax.f32 %v1585_v59, 0.0 }
 0x4d1   :  { %2155 = vmatmul.bf16.gmra.mxu3 %v1791_v45  ;;  %v1794_v25 = vpack.c.bf16 %v1726_v28, %v1725_v21  ;;  %v2197_v28 = vlaneseq  ;;  %v3952_v21 = vld [vmem:[%s4214_s0] sm:$0xff] }
 0x4d4   :  { %v1587_v48 = vpop.f32.mrf.mxu3 }
 0x4d5   :  { %v1588_v14 = vadd.f32 %v3846_v57, %v1587_v48  ;;  %v3930_v54 = vpop.f32.mrf.mxu2 }
 0x4d7   :  { %v1727_v33 = vmax.f32 %v1588_v14, 0.0 }
 0x4dc   :  { %v1589_v6 = vpop.f32.mrf.mxu3 }
 0x4dd   :  { %v1590_v58 = vadd.f32 %v3846_v57, %v1589_v6 }
 0x4df   :  { %v1728_v42 = vmax.f32 %v1590_v58, 0.0  ;;  %v1994_v58 = vadd.f32 %v3729_v24, %v3577_v36 }
 0x4e1   :  { %2160 = vmatmul.bf16.gmra.mxu3 %v1792_v50  ;;  %v1795_v30 = vpack.c.bf16 %v1728_v42, %v1727_v33  ;;  %v2982_v42 = vmov 1.0   ;;  %v2200_v33 = vperm.slane %v3952_v21, 1 }
 0x4e4   :  { %v1592_v40 = vpop.f32.mrf.mxu3 }
 0x4e5   :  { %v1593_v20 = vadd.f32 %v3846_v57, %v1592_v40  ;;  %v3935_v40 = vpop.f32.mrf.mxu2 }
 0x4e7   :  { %v1729_v10 = vmax.f32 %v1593_v20, 0.0  ;;  %v1984_v20 = vadd.f32 %v3729_v24, %v3521_v23 }
 0x4ec   :  { %v1594_v5 = vpop.f32.mrf.mxu3 }
 0x4ed   :  { %v1595_v37 = vadd.f32 %v3846_v57, %v1594_v5 }
 0x4ef   :  { %v1730_v2 = vmax.f32 %v1595_v37, 0.0  ;;  %v1987_v37 = vadd.f32 %v3729_v24, %v3532_v0 }
 0x4f1   :  { %2165 = vmatmul.bf16.gmra.mxu3 %v1793_v9  ;;  %v1796_v51 = vpack.c.bf16 %v1730_v2, %v1729_v10  ;;  %v3943_v9 = vpop.f32.mrf.mxu2  ;;  %v4250_v2 = vld [vmem:[#allocation14_spill] sm:$0xff]  ;;  %v4251_v10 = vld [vmem:[#allocation13_spill] sm:$0xff] }
 0x4f2   :  { %v1979_v0 = vadd.f32 %v3729_v24, %v4250_v2  ;;  %v4260_v2 = vld [vmem:[#allocation30_spill] sm:$0xff] }
 0x4f4   :  { %v1597_v53 = vpop.f32.mrf.mxu3 }
 0x4f5   :  { %v1598_v26 = vadd.f32 %v3846_v57, %v1597_v53 }
 0x4f7   :  { %v1731_v62 = vmax.f32 %v1598_v26, 0.0 }
 0x4fc   :  { %v1599_v18 = vpop.f32.mrf.mxu3 }
 0x4fd   :  { %v1600_v48 = vadd.f32 %v3846_v57, %v1599_v18  ;;  %v3947_v18 = vpop.f32.mrf.mxu2 }
 0x4ff   :  { %v1732_v16 = vmax.f32 %v1600_v48, 0.0  ;;  %v4252_v48 = vld [vmem:[#allocation12_spill] sm:$0xff] }
 0x500   :  { %v1974_v23 = vadd.f32 %v3729_v24, %v4252_v48  ;;  %v4262_v48 = vld [vmem:[#allocation28_spill] sm:$0xff] }
 0x501   :  { %2170 = vmatmul.bf16.gmra.mxu3 %v1794_v25  ;;  %v1797_v50 = vpack.c.bf16 %v1732_v16, %v1731_v62  ;;  %v3954_v25 = vshrl.u32 %v2197_v28, 7  ;;  %v4253_v16 = vld [vmem:[#allocation11_spill] sm:$0xff]  ;;  %v4254_v62 = vld [vmem:[#allocation10_spill] sm:$0xff] }
 0x502   :  { %v4257_v28 = vld [vmem:[#allocation7_spill] sm:$0xff] }
 0x503   :  { %vm2208_vm2 = vcmp.eq.s32.totalorder %v3954_v25, %v2200_v33  ;;  %v4258_v33 = vld [vmem:[#allocation6_spill] sm:$0xff] }
 0x504   :  { %v1602_v32 = vpop.f32.mrf.mxu3 }
 0x505   :  { %v1603_v56 = vadd.f32 %v3846_v57, %v1602_v32  ;;  %v3962_v14 = vpop.f32.mrf.mxu2 }
 0x507   :  { %v1733_v53 = vmax.f32 %v1603_v56, 0.0  ;;  %v4255_v56 = vld [vmem:[#allocation9_spill] sm:$0xff] }
 0x50c   :  { %v1604_v13 = vpop.f32.mrf.mxu3 }
 0x50d   :  { %v1605_v39 = vadd.f32 %v3846_v57, %v1604_v13  ;;  %v2199_v57 = vperm.slane %v3952_v21, 0  ;;  %v1992_v13 = vadd.f32 %v3729_v24, %v3560_v15  ;;  %v1982_v15 = vadd.f32 %v3729_v24, %v3510_v63 }
 0x50e   :  { %v1972_v63 = vadd.f32 %v3729_v24, %v4253_v16 }
 0x50f   :  { %v1734_v5 = vmax.f32 %v1605_v39, 0.0  ;;  %vm2207_vm1 = vcmp.eq.s32.totalorder %v3954_v25, %v2199_v57  ;;  %v1962_v57 = vadd.f32 %v3729_v24, %v4257_v28  ;;  %v4266_v28 = vld [vmem:[#allocation24_spill] sm:$0xff] }
 0x511   :  { %2175 = vmatmul.bf16.gmra.mxu3 %v1795_v30  ;;  %v1798_v59 = vpack.c.bf16 %v1734_v5, %v1733_v53  ;;  %v1989_v30 = vadd.f32 %v3729_v24, %v3549_v34  ;;  %v3980_v34 = vpop.f32.mrf.mxu2  ;;  %v1967_v5 = vadd.f32 %v3729_v24, %v4255_v56  ;;  %v4256_v53 = vld [vmem:[#allocation8_spill] sm:$0xff] }
 0x514   :  { %v3917_v7 = vpop.f32.mrf.mxu3 }
 0x519   :  { %v3994_v39 = vpop.f32.mrf.mxu2 }
 0x51c   :  { %v3923_v43 = vpop.f32.mrf.mxu3 }
 0x521   :  { %2180 = vmatmul.bf16.gmra.mxu3 %v1796_v51  ;;  %v1977_v51 = vadd.f32 %v3729_v24, %v4251_v10  ;;  %v4261_v10 = vld [vmem:[#allocation29_spill] sm:$0xff] }
 0x524   :  { %v3927_v45 = vpop.f32.mrf.mxu3 }
 0x52c   :  { %v3933_v6 = vpop.f32.mrf.mxu3 }
 0x531   :  { %2185 = vmatmul.bf16.gmra.mxu3 %v1797_v50  ;;  %v1969_v50 = vadd.f32 %v3729_v24, %v4254_v62 }
 0x534   :  { %v3937_v60 = vpop.f32.mrf.mxu3 }
 0x53c   :  { %v3941_v22 = vpop.f32.mrf.mxu3 }
 0x541   :  { %2190 = vmatmul.bf16.gmra.mxu3 %v1798_v59  ;;  %v1964_v59 = vadd.f32 %v3729_v24, %v4256_v53  ;;  %v4265_v53 = vld [vmem:[#allocation25_spill] sm:$0xff] }
 0x544   :  { %v3945_v46 = vpop.f32.mrf.mxu3 }
 0x54c   :  { %v3957_v32 = vpop.f32.mrf.mxu3 }
 0x551   :  { %2829 = vmatmul.msk.f32.vlgmr.msrb.gmra.mxu3 %vm2207_vm1, %v2982_v42 }
 0x552   :  { %2272 = vmatpush.msrb.mxu3 %v1994_v58  ;;  %v2201_v58 = vperm.slane %v3952_v21, 2 }
 0x554   :  { %2273 = vmatpush.msrb.mxu3 %v1992_v13  ;;  %v3973_v36 = vpop.f32.mrf.mxu3  ;;  %vm2209_vm3 = vcmp.eq.s32.totalorder %v3954_v25, %v2201_v58  ;;  %v4267_v58 = vld [vmem:[#allocation23_spill] sm:$0xff] }
 0x556   :  { %2274 = vmatpush.msrb.mxu3 %v1989_v30  ;;  %v1959_v30 = vadd.f32 %v3729_v24, %v4258_v33  ;;  %v2017_v33 = vadd.f32 %v3729_v24, %v4267_v58 }
 0x558   :  { %2275 = vmatpush.msrb.mxu3 %v1987_v37  ;;  %v4259_v37 = vld [vmem:[#allocation5_spill] sm:$0xff] }
 0x559   :  { %2830 = vmatmul.msk.f32.vlgmr.msra.gmra.mxu3 %vm2208_vm2, %v2982_v42 }
 0x55a   :  { %2276 = vmatpush.msrb.mxu3 %v1984_v20  ;;  %v1957_v20 = vadd.f32 %v3729_v24, %v4259_v37  ;;  %v4268_v37 = vld [vmem:[#allocation22_spill] sm:$0xff] }
 0x55c   :  { %2277 = vmatpush.msrb.mxu3 %v1982_v15  ;;  %v3988_v26 = vpop.f32.mrf.mxu3  ;;  %v4010_v15 = vpop.f32.mrf.mxu2 }
 0x55e   :  { %2278 = vmatpush.msrb.mxu3 %v1979_v0  ;;  %v2034_v0 = vadd.f32 %v3729_v24, %v4260_v2  ;;  %v4269_v2 = vld [vmem:[#allocation21_spill] sm:$0xff] }
 0x560   :  { %2279 = vmatpush.msrb.mxu3 %v1977_v51  ;;  %v2032_v51 = vadd.f32 %v3729_v24, %v4261_v10 }
 0x562   :  { %2280 = vmatpush.msrb.mxu3 %v1974_v23  ;;  %v2029_v23 = vadd.f32 %v3729_v24, %v4262_v48 }
 0x564   :  { %2281 = vmatpush.msrb.mxu3 %v1972_v63  ;;  %v4003_v13 = vpop.f32.mrf.mxu3  ;;  %v4263_v63 = vld [vmem:[#allocation27_spill] sm:$0xff] }
 0x565   :  { %v2027_v62 = vadd.f32 %v3729_v24, %v4263_v63 }
 0x566   :  { %2282 = vmatpush.msrb.mxu3 %v1969_v50  ;;  %v4264_v50 = vld [vmem:[#allocation26_spill] sm:$0xff] }
 0x567   :  { %v2024_v56 = vadd.f32 %v3729_v24, %v4264_v50 }
 0x568   :  { %2283 = vmatpush.msrb.mxu3 %v1967_v5  ;;  %v4025_v5 = vpop.f32.mrf.mxu2 }
 0x56a   :  { %2284 = vmatpush.msrb.mxu3 %v1964_v59  ;;  %v2022_v59 = vadd.f32 %v3729_v24, %v4265_v53  ;;  %v4273_v53 = vld [vmem:[#allocation17_spill] sm:$0xff] }
 0x56c   :  { %2285 = vmatpush.msrb.mxu3 %v1962_v57  ;;  %v4019_v16 = vpop.f32.mrf.mxu3  ;;  %v2019_v57 = vadd.f32 %v3729_v24, %v4266_v28  ;;  %v2202_v28 = vperm.slane %v3952_v21, 3 }
 0x56e   :  { %2286 = vmatpush.msrb.mxu3 %v1959_v30  ;;  %vm2210_vm4 = vcmp.eq.s32.totalorder %v3954_v25, %v2202_v28 }
 0x570   :  { %2287 = vmatpush.msrb.mxu3 %v1957_v20  ;;  %v2014_v20 = vadd.f32 %v3729_v24, %v4268_v37  ;;  %v2111_v10 = vpop.f32.mrf.mxu2  ;;  %v4275_v37 = vld [vmem:[#allocation15_spill] sm:$0xff] }
 0x571   :  { %2831 = vmatmul.msk.f32.vlgmr.msrb.gmra.mxu3 %vm2209_vm3, %v2982_v42 }
 0x572   :  { %2292 = vmatpush.msra.mxu3 %v2034_v0  ;;  %v2012_v0 = vadd.f32 %v3729_v24, %v4269_v2  ;;  %v2074_v2 = vadd.f32 %v3729_v24, %v3853_v44  ;;  %v2064_v44 = vadd.f32 %v3729_v24, %v3824_v41 }
 0x574   :  { %2293 = vmatpush.msra.mxu3 %v2032_v51  ;;  %v4033_v30 = vpop.f32.mrf.mxu3  ;;  %v4270_v51 = vld [vmem:[#allocation20_spill] sm:$0xff] }
 0x575   :  { %v2009_v48 = vadd.f32 %v3729_v24, %v4270_v51 }
 0x576   :  { %2294 = vmatpush.msra.mxu3 %v2029_v23  ;;  %v4271_v23 = vld [vmem:[#allocation19_spill] sm:$0xff] }
 0x577   :  { %v2007_v63 = vadd.f32 %v3729_v24, %v4271_v23  ;;  %v2067_v23 = vadd.f32 %v3729_v24, %v3832_v27  ;;  %v2057_v27 = vadd.f32 %v3729_v24, %v3811_v61 }
 0x578   :  { %2295 = vmatpush.msra.mxu3 %v2027_v62  ;;  %v4272_v62 = vld [vmem:[#allocation18_spill] sm:$0xff] }
 0x579   :  { %v2004_v50 = vadd.f32 %v3729_v24, %v4272_v62  ;;  %v2059_v62 = vadd.f32 %v3729_v24, %v3814_v11  ;;  %v2049_v11 = vadd.f32 %v3729_v24, %v3784_v4  ;;  %v2039_v4 = vadd.f32 %v3729_v24, %v3716_v29 }
 0x57a   :  { %2296 = vmatpush.msra.mxu3 %v2024_v56  ;;  %v2109_v29 = vadd.f32 %v3729_v24, %v4025_v5  ;;  %v2099_v5 = vadd.f32 %v3729_v24, %v3962_v14  ;;  %v2087_v14 = vadd.f32 %v3729_v24, %v3925_v17 }
 0x57c   :  { %2297 = vmatpush.msra.mxu3 %v2022_v59  ;;  %v4045_v56 = vpop.f32.mrf.mxu3  ;;  %v2002_v59 = vadd.f32 %v3729_v24, %v4273_v53  ;;  %v2047_v53 = vadd.f32 %v3729_v24, %v3759_v35  ;;  %v4276_v35 = vld [vmem:[#allocation31_spill] sm:$0xff] }
 0x57e   :  { %2298 = vmatpush.msra.mxu3 %v2019_v57  ;;  %v4274_v57 = vld [vmem:[#allocation16_spill] sm:$0xff] }
 0x57f   :  { %v1999_v58 = vadd.f32 %v3729_v24, %v4274_v57  ;;  %v2037_v57 = vadd.f32 %v3729_v24, %v4276_v35 }
 0x580   :  { %2299 = vmatpush.msra.mxu3 %v2017_v33  ;;  %v2113_v33 = vpop.f32.mrf.mxu2 }
 0x582   :  { %2300 = vmatpush.msra.mxu3 %v2014_v20  ;;  %v1997_v20 = vadd.f32 %v3729_v24, %v4275_v37 }
 0x584   :  { %2301 = vmatpush.msra.mxu3 %v2012_v0  ;;  %v2072_v0 = vadd.f32 %v3729_v24, %v3841_v49  ;;  %v4060_v51 = vpop.f32.mrf.mxu3  ;;  %v2062_v49 = vadd.f32 %v3729_v24, %v3822_v38  ;;  %v2052_v38 = vadd.f32 %v3729_v24, %v3794_v1  ;;  %v2203_v1 = vperm.slane %v3952_v21, 4 }
 0x586   :  { %2302 = vmatpush.msra.mxu3 %v2009_v48  ;;  %v2069_v48 = vadd.f32 %v3729_v24, %v3839_v8  ;;  %vm2211_vm5 = vcmp.eq.s32.totalorder %v3954_v25, %v2203_v1 }
 0x588   :  { %2303 = vmatpush.msra.mxu3 %v2007_v63  ;;  %v4066_v63 = vpop.f32.mrf.mxu2 }
 0x58a   :  { %2304 = vmatpush.msra.mxu3 %v2004_v50  ;;  %v2054_v50 = vadd.f32 %v3729_v24, %v3802_v52  ;;  %v2044_v52 = vadd.f32 %v3729_v24, %v3739_v55  ;;  %v2114_v55 = vadd.f32 %v3729_v24, %v2113_v33  ;;  %v2104_v33 = vadd.f32 %v3729_v24, %v3994_v39 }
 0x58b   :  { %v2092_v39 = vadd.f32 %v3729_v24, %v3935_v40  ;;  %v2204_v40 = vperm.slane %v3952_v21, 5 }
 0x58c   :  { %2305 = vmatpush.msra.mxu3 %v2002_v59  ;;  %v4074_v8 = vpop.f32.mrf.mxu3  ;;  %v2042_v59 = vadd.f32 %v3729_v24, %v3723_v19  ;;  %v2112_v19 = vadd.f32 %v3729_v24, %v2111_v10 }
 0x58d   :  { %vm2212_vm6 = vcmp.eq.s32.totalorder %v3954_v25, %v2204_v40 }
 0x58e   :  { %2306 = vmatpush.msra.mxu3 %v1999_v58 }
 0x590   :  { %2307 = vmatpush.msra.mxu3 %v1997_v20  ;;  %v4080_v41 = vpop.f32.mrf.mxu2  ;;  %v2107_v20 = vadd.f32 %v3729_v24, %v4010_v15 }
 0x591   :  { %2832 = vmatmul.msk.f32.vlgmr.msra.gmra.mxu3 %vm2210_vm4, %v2982_v42 }
 0x592   :  { %2312 = vmatpush.msrb.mxu3 %v2074_v2  ;;  %v2102_v2 = vadd.f32 %v3729_v24, %v3980_v34  ;;  %v2089_v34 = vadd.f32 %v3729_v24, %v3930_v54  ;;  %v2079_v54 = vadd.f32 %v3729_v24, %v3911_v3 }
 0x594   :  { %2313 = vmatpush.msrb.mxu3 %v2072_v0  ;;  %v4088_v61 = vpop.f32.mrf.mxu3  ;;  %v2097_v0 = vadd.f32 %v3729_v24, %v3947_v18  ;;  %v2084_v18 = vadd.f32 %v3729_v24, %v3919_v47  ;;  %v2154_v47 = vadd.f32 %v3729_v24, %v3957_v32 }
 0x596   :  { %2314 = vmatpush.msrb.mxu3 %v2069_v48  ;;  %v2094_v48 = vadd.f32 %v3729_v24, %v3943_v9 }
 0x598   :  { %2315 = vmatpush.msrb.mxu3 %v2067_v23  ;;  %v4095_v28 = vpop.f32.mrf.mxu2 }
 0x59a   :  { %2316 = vmatpush.msrb.mxu3 %v2064_v44  ;;  %v2082_v44 = vadd.f32 %v3729_v24, %v3915_v12  ;;  %v4149_v12 = vld [vmem:[%s4221_s7] ss:$0 sm:$0xff]  ;;  %s2983_s7 = smov [#allocation2]  }
 0x59b   :  { %v2152_v3 = vadd.f32 %v4149_v12, %v3945_v46  ;;  %v2144_v32 = vadd.f32 %v4149_v12, %v3933_v6  ;;  %v2139_v46 = vadd.f32 %v4149_v12, %v3923_v43  ;;  %s2422_s26 = sshll.u32 %s2983_s7, 4  ;;  %s2423_s26 = int_to_ptr.vmem [resolvable:$true] %s2422_s26 }
 0x59c   :  { %2317 = vmatpush.msrb.mxu3 %v2062_v49  ;;  %v4103_v58 = vpop.f32.mrf.mxu3  ;;  %v2077_v49 = vadd.f32 %v3729_v24, %v3907_v31  ;;  %v2147_v24 = vadd.f32 %v4149_v12, %v3937_v60 }
 0x59e   :  { %2318 = vmatpush.msrb.mxu3 %v2059_v62  ;;  %v2149_v62 = vadd.f32 %v4149_v12, %v3941_v22  ;;  %v2137_v22 = vadd.f32 %v4149_v12, %v3917_v7  ;;  %v2122_v7 = vadd.f32 %v4149_v12, %v4095_v28 }
 0x5a0   :  { %2319 = vmatpush.msrb.mxu3 %v2057_v27  ;;  %v4109_v37 = vpop.f32.mrf.mxu2 }
 0x5a1   :  { %v2124_v43 = vadd.f32 %v4149_v12, %v4109_v37  ;;  %v2174_v37 = vadd.f32 %v4149_v12, %v4074_v8  ;;  %v2162_v8 = vadd.f32 %v4149_v12, %v4003_v13 }
 0x5a2   :  { %2320 = vmatpush.msrb.mxu3 %v2054_v50  ;;  %v2142_v50 = vadd.f32 %v4149_v12, %v3927_v45 }
 0x5a4   :  { %2321 = vmatpush.msrb.mxu3 %v2052_v38  ;;  %v4117_v10 = vpop.f32.mrf.mxu3 }
 0x5a6   :  { %2322 = vmatpush.msrb.mxu3 %v2049_v11 }
 0x5a8   :  { %2323 = vmatpush.msrb.mxu3 %v2047_v53  ;;  %v2126_v15 = vpop.f32.mrf.mxu2 }
 0x5a9   :  { %v2127_v45 = vadd.f32 %v4149_v12, %v2126_v15 }
 0x5aa   :  { %2324 = vmatpush.msrb.mxu3 %v2044_v52  ;;  %v2205_v52 = vperm.slane %v3952_v21, 6 }
 0x5ac   :  { %2325 = vmatpush.msrb.mxu3 %v2042_v59  ;;  %v4129_v23 = vpop.f32.mrf.mxu3  ;;  %v2119_v59 = vadd.f32 %v4149_v12, %v4080_v41  ;;  %vm2213_vm7 = vcmp.eq.s32.totalorder %v3954_v25, %v2205_v52 }
 0x5ae   :  { %2326 = vmatpush.msrb.mxu3 %v2039_v4  ;;  %v2117_v4 = vadd.f32 %v4149_v12, %v4066_v63  ;;  %v2184_v63 = vadd.f32 %v4149_v12, %v4129_v23 }
 0x5b0   :  { %2327 = vmatpush.msrb.mxu3 %v2037_v57  ;;  %v2128_v9 = vpop.f32.mrf.mxu2 }
 0x5b1   :  { %2833 = vmatmul.msk.f32.vlgmr.msrb.gmra.mxu3 %vm2211_vm5, %v2982_v42  ;;  %v2129_v53 = vadd.f32 %v4149_v12, %v2128_v9 }
 0x5b2   :  { %2332 = vmatpush.msra.mxu3 %v2114_v55  ;;  %v2182_v55 = vadd.f32 %v4149_v12, %v4117_v10 }
 0x5b4   :  { %2333 = vmatpush.msra.mxu3 %v2112_v19  ;;  %v2186_v17 = vpop.f32.mrf.mxu3  ;;  %v2179_v19 = vadd.f32 %v4149_v12, %v4103_v58  ;;  %v2167_v58 = vadd.f32 %v4149_v12, %v4033_v30 }
 0x5b5   :  { %v2187_v41 = vadd.f32 %v4149_v12, %v2186_v17 }
 0x5b6   :  { %2334 = vmatpush.msra.mxu3 %v2109_v29  ;;  %v2177_v29 = vadd.f32 %v4149_v12, %v4088_v61  ;;  %v2164_v61 = vadd.f32 %v4149_v12, %v4019_v16 }
 0x5b8   :  { %2335 = vmatpush.msra.mxu3 %v2107_v20  ;;  %v2131_v31 = vpop.f32.mrf.mxu2  ;;  %v2172_v20 = vadd.f32 %v4149_v12, %v4060_v51  ;;  %v2159_v51 = vadd.f32 %v4149_v12, %v3988_v26 }
 0x5b9   :  { %v2132_v6 = vadd.f32 %v4149_v12, %v2131_v31 }
 0x5ba   :  { %2336 = vmatpush.msra.mxu3 %v2104_v33  ;;  %v2169_v33 = vadd.f32 %v4149_v12, %v4045_v56  ;;  %v2157_v56 = vadd.f32 %v4149_v12, %v3973_v36 }
 0x5bc   :  { %2337 = vmatpush.msra.mxu3 %v2102_v2  ;;  %v2188_v27 = vpop.f32.mrf.mxu3  ;;  %v2206_v2 = vperm.slane %v3952_v21, 7 }
 0x5bd   :  { %v2189_v57 = vadd.f32 %v4149_v12, %v2188_v27 }
 0x5be   :  { %2338 = vmatpush.msra.mxu3 %v2099_v5  ;;  %vm2214_vm8 = vcmp.eq.s32.totalorder %v3954_v25, %v2206_v2 }
 0x5c0   :  { %2339 = vmatpush.msra.mxu3 %v2097_v0  ;;  %v2133_v38 = vpop.f32.mrf.mxu2 }
 0x5c1   :  { %v2134_v60 = vadd.f32 %v4149_v12, %v2133_v38 }
 0x5c2   :  { %2340 = vmatpush.msra.mxu3 %v2094_v48 }
 0x5c4   :  { %2341 = vmatpush.msra.mxu3 %v2092_v39  ;;  %v2191_v11 = vpop.f32.mrf.mxu3 }
 0x5c5   :  { %v2192_v28 = vadd.f32 %v4149_v12, %v2191_v11 }
 0x5c6   :  { %2342 = vmatpush.msra.mxu3 %v2089_v34 }
 0x5c8   :  { %2343 = vmatpush.msra.mxu3 %v2087_v14 }
 0x5ca   :  { %2344 = vmatpush.msra.mxu3 %v2084_v18 }
 0x5cc   :  { %2345 = vmatpush.msra.mxu3 %v2082_v44  ;;  %v2193_v1 = vpop.f32.mrf.mxu3 }
 0x5cd   :  { %v2194_v35 = vadd.f32 %v4149_v12, %v2193_v1 }
 0x5ce   :  { %2346 = vmatpush.msra.mxu3 %v2079_v54 }
 0x5d0   :  { %2347 = vmatpush.msra.mxu3 %v2077_v49 }
 0x5d1   :  { %2834 = vmatmul.msk.f32.vlgmr.msra.gmra.mxu3 %vm2212_vm6, %v2982_v42 }
 0x5d2   :  { %2352 = vmatpush.msrb.mxu3 %v2154_v47 }
 0x5d4   :  { %2353 = vmatpush.msrb.mxu3 %v2152_v3  ;;  %v2249_v16 = vpop.f32.mrf.mxu3 }
 0x5d6   :  { %2354 = vmatpush.msrb.mxu3 %v2149_v62 }
 0x5d8   :  { %2355 = vmatpush.msrb.mxu3 %v2147_v24 }
 0x5da   :  { %2356 = vmatpush.msrb.mxu3 %v2144_v32 }
 0x5dc   :  { %2357 = vmatpush.msrb.mxu3 %v2142_v50  ;;  %v2269_v30 = vpop.f32.mrf.mxu3 }
 0x5dd   :  { %v2270_v21 = vadd.f32 %v2269_v30, %v2249_v16 }
 0x5de   :  { %2358 = vmatpush.msrb.mxu3 %v2139_v46 }
 0x5e0   :  { %2359 = vmatpush.msrb.mxu3 %v2137_v22 }
 0x5e2   :  { %2360 = vmatpush.msrb.mxu3 %v2134_v60 }
 0x5e4   :  { %2361 = vmatpush.msrb.mxu3 %v2132_v6 }
 0x5e6   :  { %2362 = vmatpush.msrb.mxu3 %v2129_v53 }
 0x5e8   :  { %2363 = vmatpush.msrb.mxu3 %v2127_v45 }
 0x5ea   :  { %2364 = vmatpush.msrb.mxu3 %v2124_v43 }
 0x5ec   :  { %2365 = vmatpush.msrb.mxu3 %v2122_v7 }
 0x5ee   :  { %2366 = vmatpush.msrb.mxu3 %v2119_v59 }
 0x5f0   :  { %2367 = vmatpush.msrb.mxu3 %v2117_v4 }
 0x5f1   :  { %2835 = vmatmul.msk.f32.vlgmr.msrb.gmra.mxu3 %vm2213_vm7, %v2982_v42 }
 0x5f2   :  { %2372 = vmatpush.msra.mxu3 %v2194_v35 }
 0x5f4   :  { %2373 = vmatpush.msra.mxu3 %v2192_v28  ;;  %v2289_v10 = vpop.f32.mrf.mxu3 }
 0x5f5   :  { %v2290_v15 = vadd.f32 %v2289_v10, %v2270_v21 }
 0x5f6   :  { %2374 = vmatpush.msra.mxu3 %v2189_v57 }
 0x5f8   :  { %2375 = vmatpush.msra.mxu3 %v2187_v41 }
 0x5fa   :  { %2376 = vmatpush.msra.mxu3 %v2184_v63 }
 0x5fc   :  { %2377 = vmatpush.msra.mxu3 %v2182_v55 }
 0x5fe   :  { %2378 = vmatpush.msra.mxu3 %v2179_v19 }
 0x600   :  { %2379 = vmatpush.msra.mxu3 %v2177_v29 }
 0x602   :  { %2380 = vmatpush.msra.mxu3 %v2174_v37 }
 0x604   :  { %2381 = vmatpush.msra.mxu3 %v2172_v20 }
 0x606   :  { %2382 = vmatpush.msra.mxu3 %v2169_v33 }
 0x608   :  { %2383 = vmatpush.msra.mxu3 %v2167_v58 }
 0x60a   :  { %2384 = vmatpush.msra.mxu3 %v2164_v61 }
 0x60c   :  { %2385 = vmatpush.msra.mxu3 %v2162_v8 }
 0x60e   :  { %2386 = vmatpush.msra.mxu3 %v2159_v51 }
 0x610   :  { %2387 = vmatpush.msra.mxu3 %v2157_v56 }
 0x611   :  { %2836 = vmatmul.msk.f32.vlgmr.msra.gmra.mxu3 %vm2214_vm8, %v2982_v42 }
 0x614   :  { %v2309_v13 = vpop.f32.mrf.mxu3 }
 0x615   :  { %v2310_v26 = vadd.f32 %v2309_v13, %v2290_v15 }
 0x634   :  { %v2329_v5 = vpop.f32.mrf.mxu3 }
 0x635   :  { %v2330_v39 = vadd.f32 %v2329_v5, %v2310_v26 }
 0x654   :  { %v2349_v0 = vpop.f32.mrf.mxu3 }
 0x655   :  { %v2350_v34 = vadd.f32 %v2349_v0, %v2330_v39 }
 0x674   :  { %v2369_v48 = vpop.f32.mrf.mxu3 }
 0x675   :  { %v2370_v23 = vadd.f32 %v2369_v48, %v2350_v34 }
 0x694   :  { %v2389_v36 = vpop.f32.mrf.mxu3 }
 0x695   :  { %v2390_v14 = vadd.f32 %v2389_v36, %v2370_v23 }
 0x697   :  { %v2398_v18 = vmax.f32 %v2390_v14, 0.0 }
 0x699   :  { %2399 = vmax.xlane.f32.xlu0 %v2398_v18 }
 0x70c   :  { %v2400_v25 = vpop.xlane.xlu0 %2399 }
 0x70d   :  { %2941 = vrcp.f32 %v2400_v25  ;;  %v2412_v40 = vand.u32 2147483648, %v2400_v25  ;;  %v2410_v49 = vand.u32 2147483647, %v2400_v25  ;;  %vm2406_vm10 = vweird.f32 %v2400_v25 }
 0x70f   :  { %v2413_v47 = vor.u32 1.1754944e-38, %v2412_v40  ;;  %vm2411_vm12 = vcmp.eq.f32.partialorder %v2410_v49, 8.507059e+37 }
 0x713   :  { %v2942_v42 = vpop.eup %2941 }
 0x714   :  { %v2402_v9 = vmul.f32 %v2942_v42, %v2400_v25  ;;  %vm2407_vm9 = vweird.f32 %v2942_v42 }
 0x715   :  { %vm2408_vm11 = vmor %vm2406_vm10, %vm2407_vm9 }
 0x716   :  { %v2403_v44 = vsub.f32 1.0, %v2402_v9 }
 0x718   :  { %v2404_v54 = vmul.f32 %v2942_v42, %v2403_v44 }
 0x71a   :  { %v2405_v17 = vadd.f32 %v2942_v42, %v2404_v54 }
 0x71c   :  { %v2409_v12 = vsel %vm2408_vm11, %v2942_v42, %v2405_v17 }
 0x71d   :  { %v2414_v3 = vsel %vm2411_vm12, %v2413_v47, %v2409_v12 }
 0x71e   :  { %v2415_v31 = vmul.f32 %v2414_v3, %v2398_v18 }
 0x720   :  { %2416 = vst [vmem:[#allocation2] sm:$0xff] %v2415_v31 }
 0x721   :  { %2427 = dma.vmem_to_hbm [thread:$0]  %s2423_s26, 128, %s2425_s29, [#allocation3]  }
 0x722   :  { %2980 = dma.done.wait [#allocation3], 128  }
 0x723   :  { %2981 = vsyncadd [#allocation3], 4294967168 }
 0x724   :  { %2432 = vsyncpa [#allocation3], 1 }

</bundles_post_ra>
